<compile_context>
chip_gen: v6e
topology: v6e:2x2x1
jax: 0.10.0
libtpu: 0.0.40
codegen_flags: <defaults>
</compile_context>

<pallas_src>
import numpy as np
import jax
import jax.numpy as jnp
from jax.experimental import pallas as pl
from jax.experimental.pallas import tpu as pltpu


D_IN = 784        # 28*28
H1 = 256
H2 = 128
N_MASKS = 49
N_MASKS_PAD = 64  # 49 padded to a clean lane multiple; extra rows are zero


# ----------------------------------------------------------------------------
# Pallas kernel: 3 matmuls + relu/sigmoid + mask matmul, one batch tile / step
# ----------------------------------------------------------------------------
def focuser_kernel(x_ref, w1_ref, b1_ref, w2_ref, b2_ref, w3_ref, b3_ref,
                   masks_ref, out_ref):
    # Cast the streamed x tile to the resident weight dtype so the first dot
    # hits the fast MXU path (v5e has no fast f32 matmul) even if x is f32.
    x = x_ref[...].astype(w1_ref.dtype)                               # (TM, 784)

    h1 = jnp.dot(x, w1_ref[...], preferred_element_type=jnp.float32)
    h1 = jnp.maximum(h1 + b1_ref[...].astype(jnp.float32), 0.0)       # (TM, 256) f32

    h2 = jnp.dot(h1.astype(w2_ref.dtype), w2_ref[...],
                 preferred_element_type=jnp.float32)
    h2 = jnp.maximum(h2 + b2_ref[...].astype(jnp.float32), 0.0)       # (TM, 128) f32

    logits = jnp.dot(h2.astype(w3_ref.dtype), w3_ref[...],
                     preferred_element_type=jnp.float32)
    logits = logits + b3_ref[...].astype(jnp.float32)                 # (TM, 64)
    w = jax.nn.sigmoid(logits)                                        # (TM, 64) f32

    # einsum('ij,jk->ijk', w, masks).sum(1) == w @ masks.  Padded lanes 49..63
    # are sigmoid(0)=0.5 but hit all-zero mask rows -> exactly neutral.
    # TODO(synk): if the consumer can accept the (B, 49) weights directly
    # (masks are disjoint 0/1 blocks), returning them instead of the (B, 784)
    # expansion would cut output HBM traffic ~16x.
    out_ref[...] = jnp.dot(w.astype(masks_ref.dtype), masks_ref[...],
                           preferred_element_type=jnp.float32
                           ).astype(out_ref.dtype)                    # (TM, 784)


# ----------------------------------------------------------------------------
# Generation-aware tiling / VMEM budget
# ----------------------------------------------------------------------------
def _round_up(n, m):
    return ((n + m - 1) // m) * m


def _vmem_capacity_bytes():
    try:
        info = pltpu.get_tpu_info()
        cap = getattr(info, "vmem_capacity_bytes", None)
        if cap:
            return int(cap)
    except Exception:
        pass
    return 64 << 20   # conservative fallback: v7x physical VMEM


def _choose_tm(B, compute_dtype, vmem_cap_bytes):
    small_dtype = jnp.dtype(compute_dtype).itemsize <= 2
    if vmem_cap_bytes >= (100 << 20):        # v5e / v6e: 128 MiB physical VMEM
        cap = 4096 if small_dtype else 2048
    else:                                    # v7x: 64 MiB physical VMEM
        cap = 2048 if small_dtype else 1024
    tm = min(cap, _round_up(B, 8))
    # Keep >= 2 grid steps whenever the batch can be split, so the "parallel"
    # grid axis has something to shard across v7x's two TensorCores.
    if B >= 16 and pl.cdiv(B, tm) < 2:
        tm = _round_up(pl.cdiv(B, 2), 8)
    return max(tm, 8)


def _vmem_limit_bytes(tm, w_itemsize, x_itemsize, out_itemsize, vmem_cap):
    n_weight_elems = (D_IN * H1 + H1 + H1 * H2 + H2
                      + H2 * N_MASKS_PAD + N_MASKS_PAD + N_MASKS_PAD * D_IN)
    weights = n_weight_elems * w_itemsize             # VMEM-resident params/masks
    io = 2 * tm * D_IN * (x_itemsize + out_itemsize)  # double-buffered x/out tiles
    acts = tm * (D_IN + H1 + H2 + N_MASKS_PAD) * 4    # f32 intermediates
    limit = int((2 * weights + io + acts) * 1.5) + (8 << 20)
    return int(min(max(limit, 16 << 20), int(vmem_cap * 0.8)))


# ----------------------------------------------------------------------------
# One-time parameter prep (padding + dtype cast hoisted out of the forward)
# ----------------------------------------------------------------------------
def prepare_focuser_params(params, masks, compute_dtype=jnp.bfloat16):
    """params: (w1,b1,w2,b2,w3,b3) unpadded f32; masks: (49, 784)."""
    w1, b1, w2, b2, w3, b3 = params
    w3p = jnp.zeros((H2, N_MASKS_PAD), w3.dtype).at[:, :N_MASKS].set(w3)
    b3p = jnp.zeros((1, N_MASKS_PAD), b3.dtype).at[:, :N_MASKS].set(b3)
    masks_p = jnp.zeros((N_MASKS_PAD, D_IN), masks.dtype).at[:N_MASKS, :].set(masks)
    cast = lambda a: a.astype(compute_dtype)
    tensors = tuple(cast(a) for a in (w1, b1, w2, b2, w3p, b3p, masks_p))
    return {"dtype": jnp.dtype(compute_dtype), "tensors": tensors}


# ----------------------------------------------------------------------------
# pallas_call wrapper
# ----------------------------------------------------------------------------
_SINGLE_BUFFER_CONSTS = None   # probed once: does this jax accept pl.Buffered(1)?


def _focuser_call(x, tensors, tm, out_dtype, vmem_limit, single_buffer_consts):
    w1, b1, w2, b2, w3, b3, masks = tensors
    B = x.shape[0]
    grid = (pl.cdiv(B, tm),)

    # x / out move with the batch grid; weights & masks are VMEM-resident.
    tile_spec = pl.BlockSpec((tm, D_IN), lambda i: (i, 0))
    if single_buffer_consts:
        # Constant index_map -> never re-DMA'd; single-buffer to save VMEM.
        const_spec = lambda s: pl.BlockSpec(s, lambda i: (0, 0),
                                            pipeline_mode=pl.Buffered(1))
    else:
        const_spec = lambda s: pl.BlockSpec(s, lambda i: (0, 0))

    return pl.pallas_call(
        focuser_kernel,
        out_shape=jax.ShapeDtypeStruct((B, D_IN), out_dtype),
        grid=grid,
        in_specs=[
            tile_spec,                                    # x
            const_spec((D_IN, H1)), const_spec((1, H1)),  # w1, b1
            const_spec((H1, H2)),   const_spec((1, H2)),  # w2, b2
            const_spec((H2, N_MASKS_PAD)), const_spec((1, N_MASKS_PAD)),  # w3, b3
            const_spec((N_MASKS_PAD, D_IN)),              # masks
        ],
        out_specs=tile_spec,
        compiler_params=pltpu.CompilerParams(
            dimension_semantics=("parallel",),            # shards batch tiles on v7x
            vmem_limit_bytes=vmem_limit,
        ),
    )(x, w1, b1, w2, b2, w3, b3, masks)


def focuser_forward(x, prepped, out_dtype=None):
    """x: (B, 784); prepped: output of prepare_focuser_params()."""
    global _SINGLE_BUFFER_CONSTS
    compute_dtype = prepped["dtype"]
    tensors = prepped["tensors"]
    if out_dtype is None:
        out_dtype = compute_dtype        # bf16 out halves write traffic by default

    B = x.shape[0]
    # Stream x in the compute dtype (halves x read bytes on the bf16 path).
    # If x comes from an upstream jitted op, emit it in bf16 there and this
    # cast becomes a no-op.
    x_c = x if x.dtype == compute_dtype else x.astype(compute_dtype)

    vmem_cap = _vmem_capacity_bytes()
    tm = _choose_tm(B, compute_dtype, vmem_cap)
    vmem_limit = _vmem_limit_bytes(tm,
                                   jnp.dtype(compute_dtype).itemsize,
                                   jnp.dtype(x_c.dtype).itemsize,
                                   jnp.dtype(out_dtype).itemsize,
                                   vmem_cap)

    modes = ([True, False] if _SINGLE_BUFFER_CONSTS is None
             else [_SINGLE_BUFFER_CONSTS])
    last_err = None
    for single_buffer in modes:
        try:
            out = _focuser_call(x_c, tensors, tm, out_dtype, vmem_limit,
                                single_buffer)
            out = jax.block_until_ready(out)
            _SINGLE_BUFFER_CONSTS = single_buffer
            return out
        except Exception as err:   # pl.Buffered(1) rejected -> double-buffered fallback
            last_err = err
    raise last_err


# ----------------------------------------------------------------------------
# Glue: deterministic parameter init + mask generation (mirrors __init__)
# ----------------------------------------------------------------------------
def generate_masks():
    masks = np.zeros((N_MASKS, 28, 28), dtype=np.float32)
    idx = 0
    for i in range(7):
        for j in range(7):
            masks[idx, i * 4:(i + 1) * 4, j * 4:(j + 1) * 4] = 1.0
            idx += 1
    return jnp.asarray(masks.reshape(N_MASKS, -1))        # (49, 784)


def init_params(key):
    dims = [(D_IN, H1), (H1, H2), (H2, N_MASKS)]
    params = []
    for (d_in, d_out) in dims:
        key, kw, kb = jax.random.split(key, 3)
        bound = 1.0 / np.sqrt(d_in)                 # torch Linear default init range
        W = jax.random.uniform(kw, (d_in, d_out), jnp.float32, -bound, bound)
        b = jax.random.uniform(kb, (1, d_out), jnp.float32, -bound, bound)
        params += [W, b]
    return tuple(params)


def focuser_reference(x, params, masks):
    w1, b1, w2, b2, w3, b3 = params
    h1 = jnp.maximum(x @ w1 + b1, 0.0)
    h2 = jnp.maximum(h1 @ w2 + b2, 0.0)
    w = jax.nn.sigmoid(h2 @ w3 + b3)
    return w @ masks


if __name__ == "__main__":
    key = jax.random.PRNGKey(0)
    key, kx1, kx2 = jax.random.split(key, 3)

    params = init_params(key)
    masks = generate_masks()

    prep_f32 = prepare_focuser_params(params, masks, compute_dtype=jnp.float32)
    prep_bf16 = prepare_focuser_params(params, masks)   # default bf16 fast path

    # 1) small batch, f32 path, exact agreement with the reference
    x_small = jax.random.normal(kx1, (8, D_IN), dtype=jnp.float32)
    out = focuser_forward(x_small, prep_f32, out_dtype=jnp.float32)
    out = jax.block_until_ready(out)
    ref = focuser_reference(x_small, params, masks)
    np.testing.assert_allclose(np.asarray(out), np.asarray(ref),
                               rtol=1e-5, atol=1e-5)

    # 2) ragged batch (grid of 2 tiles, last one partial), f32 path, exact
    x_rag = jax.random.normal(kx2, (72, D_IN), dtype=jnp.float32)
    out_rag = focuser_forward(x_rag, prep_f32, out_dtype=jnp.float32)
    out_rag = jax.block_until_ready(out_rag)
    ref_rag = focuser_reference(x_rag, params, masks)
    np.testing.assert_allclose(np.asarray(out_rag), np.asarray(ref_rag),
                               rtol=1e-5, atol=1e-5)

    # 3) default bf16 streaming path (bf16 in/out, f32 accumulation), loose tol
    out_bf = focuser_forward(x_rag, prep_bf16)
    out_bf = jax.block_until_ready(out_bf)
    out_bf32 = np.asarray(out_bf.astype(jnp.float32))
    diff = float(np.max(np.abs(out_bf32 - np.asarray(ref_rag))))
    assert diff < 7.5e-2, f"bf16 path max abs diff too large: {diff}"

    print("KERNEL_OK")
</pallas_src>

<mosaic_0001>
module attributes {stable_mosaic.version = 11 : i64} {
  func.func @focuser_kernel(%arg0: i32, %arg1: memref<8x784xf32, #tpu.memory_space<vmem>>, %arg2: memref<784x256xf32, #tpu.memory_space<vmem>>, %arg3: memref<1x256xf32, #tpu.memory_space<vmem>>, %arg4: memref<256x128xf32, #tpu.memory_space<vmem>>, %arg5: memref<1x128xf32, #tpu.memory_space<vmem>>, %arg6: memref<128x64xf32, #tpu.memory_space<vmem>>, %arg7: memref<1x64xf32, #tpu.memory_space<vmem>>, %arg8: memref<64x784xf32, #tpu.memory_space<vmem>>, %arg9: memref<8x784xf32, #tpu.memory_space<vmem>>) attributes {dimension_semantics = [#tpu.dimension_semantics<parallel>], iteration_bounds = array<i64: 1>, scalar_prefetch = 0 : i64, scratch_operands = 0 : i64, tpu.core_type = #tpu.core_type<tc>, window_params = [{transform_indices = @transform_0, window_bounds = array<i64: 8, 784>}, {pipeline_mode = #tpu.pipeline_mode<synchronous>, transform_indices = @transform_1, window_bounds = array<i64: 784, 256>}, {pipeline_mode = #tpu.pipeline_mode<synchronous>, transform_indices = @transform_2, window_bounds = array<i64: 1, 256>}, {pipeline_mode = #tpu.pipeline_mode<synchronous>, transform_indices = @transform_3, window_bounds = array<i64: 256, 128>}, {pipeline_mode = #tpu.pipeline_mode<synchronous>, transform_indices = @transform_4, window_bounds = array<i64: 1, 128>}, {pipeline_mode = #tpu.pipeline_mode<synchronous>, transform_indices = @transform_5, window_bounds = array<i64: 128, 64>}, {pipeline_mode = #tpu.pipeline_mode<synchronous>, transform_indices = @transform_6, window_bounds = array<i64: 1, 64>}, {pipeline_mode = #tpu.pipeline_mode<synchronous>, transform_indices = @transform_7, window_bounds = array<i64: 64, 784>}, {transform_indices = @transform_8, window_bounds = array<i64: 8, 784>}]} {
    %c0 = arith.constant 0 : index
    %c0_0 = arith.constant 0 : index
    %0 = vector.load %arg1[%c0, %c0_0] : memref<8x784xf32, #tpu.memory_space<vmem>>, vector<8x784xf32>
    %c0_1 = arith.constant 0 : index
    %c0_2 = arith.constant 0 : index
    %1 = vector.load %arg2[%c0_1, %c0_2] : memref<784x256xf32, #tpu.memory_space<vmem>>, vector<784x256xf32>
    %cst = arith.constant dense<0.000000e+00> : vector<8x256xf32>
    %2 = tpu.matmul %0, %1, %cst {dimension_numbers = #tpu.dot_dimension_numbers<[1], [0], [0], [1], [0, 0, 1, 1], [], []>} : vector<8x784xf32>, vector<784x256xf32>, vector<8x256xf32> -> vector<8x256xf32>
    %c0_3 = arith.constant 0 : index
    %c0_4 = arith.constant 0 : index
    %3 = vector.load %arg3[%c0_3, %c0_4] : memref<1x256xf32, #tpu.memory_space<vmem>>, vector<1x256xf32>
    %4 = vector.broadcast %3 : vector<1x256xf32> to vector<8x256xf32>
    %5 = arith.addf %2, %4 : vector<8x256xf32>
    %cst_5 = arith.constant 0.000000e+00 : f32
    %6 = vector.broadcast %cst_5 : f32 to vector<8x256xf32>
    %7 = arith.maximumf %5, %6 : vector<8x256xf32>
    %c0_6 = arith.constant 0 : index
    %c0_7 = arith.constant 0 : index
    %8 = vector.load %arg4[%c0_6, %c0_7] : memref<256x128xf32, #tpu.memory_space<vmem>>, vector<256x128xf32>
    %cst_8 = arith.constant dense<0.000000e+00> : vector<8x128xf32>
    %9 = tpu.matmul %7, %8, %cst_8 {dimension_numbers = #tpu.dot_dimension_numbers<[1], [0], [0], [1], [0, 0, 1, 1], [], []>} : vector<8x256xf32>, vector<256x128xf32>, vector<8x128xf32> -> vector<8x128xf32>
    %c0_9 = arith.constant 0 : index
    %c0_10 = arith.constant 0 : index
    %10 = vector.load %arg5[%c0_9, %c0_10] : memref<1x128xf32, #tpu.memory_space<vmem>>, vector<1x128xf32>
    %11 = vector.broadcast %10 : vector<1x128xf32> to vector<8x128xf32>
    %12 = arith.addf %9, %11 : vector<8x128xf32>
    %cst_11 = arith.constant 0.000000e+00 : f32
    %13 = vector.broadcast %cst_11 : f32 to vector<8x128xf32>
    %14 = arith.maximumf %12, %13 : vector<8x128xf32>
    %c0_12 = arith.constant 0 : index
    %c0_13 = arith.constant 0 : index
    %15 = vector.load %arg6[%c0_12, %c0_13] : memref<128x64xf32, #tpu.memory_space<vmem>>, vector<128x64xf32>
    %cst_14 = arith.constant dense<0.000000e+00> : vector<8x64xf32>
    %16 = tpu.matmul %14, %15, %cst_14 {dimension_numbers = #tpu.dot_dimension_numbers<[1], [0], [0], [1], [0, 0, 1, 1], [], []>} : vector<8x128xf32>, vector<128x64xf32>, vector<8x64xf32> -> vector<8x64xf32>
    %c0_15 = arith.constant 0 : index
    %c0_16 = arith.constant 0 : index
    %17 = vector.load %arg7[%c0_15, %c0_16] : memref<1x64xf32, #tpu.memory_space<vmem>>, vector<1x64xf32>
    %18 = vector.broadcast %17 : vector<1x64xf32> to vector<8x64xf32>
    %19 = arith.addf %16, %18 : vector<8x64xf32>
    %20 = arith.negf %19 : vector<8x64xf32>
    %21 = math.exp %20 : vector<8x64xf32>
    %cst_17 = arith.constant 1.000000e+00 : f32
    %22 = vector.broadcast %cst_17 : f32 to vector<8x64xf32>
    %23 = arith.addf %22, %21 : vector<8x64xf32>
    %24 = arith.divf %22, %23 : vector<8x64xf32>
    %c0_18 = arith.constant 0 : index
    %c0_19 = arith.constant 0 : index
    %25 = vector.load %arg8[%c0_18, %c0_19] : memref<64x784xf32, #tpu.memory_space<vmem>>, vector<64x784xf32>
    %cst_20 = arith.constant dense<0.000000e+00> : vector<8x784xf32>
    %26 = tpu.matmul %24, %25, %cst_20 {dimension_numbers = #tpu.dot_dimension_numbers<[1], [0], [0], [1], [0, 0, 1, 1], [], []>} : vector<8x64xf32>, vector<64x784xf32>, vector<8x784xf32> -> vector<8x784xf32>
    %c0_21 = arith.constant 0 : index
    %c0_22 = arith.constant 0 : index
    %27 = vector.load %arg9[%c0_21, %c0_22] : memref<8x784xf32, #tpu.memory_space<vmem>>, vector<8x784xf32>
    tpu.vector_store %arg9[%c0_21, %c0_22], %26 {strides = array<i32>} : memref<8x784xf32, #tpu.memory_space<vmem>>, vector<8x784xf32>,
    return
  }
  func.func @transform_0(%arg0: i32) -> (i32, i32) {
    %c0_i32 = arith.constant 0 : i32
    %c0_i32_0 = arith.constant 0 : i32
    return %arg0, %c0_i32 : i32, i32
  }
  func.func @transform_1(%arg0: i32) -> (i32, i32) {
    %c0_i32 = arith.constant 0 : i32
    %c0_i32_0 = arith.constant 0 : i32
    %c0_i32_1 = arith.constant 0 : i32
    return %c0_i32, %c0_i32_0 : i32, i32
  }
  func.func @transform_2(%arg0: i32) -> (i32, i32) {
    %c0_i32 = arith.constant 0 : i32
    %c0_i32_0 = arith.constant 0 : i32
    %c0_i32_1 = arith.constant 0 : i32
    return %c0_i32, %c0_i32_0 : i32, i32
  }
  func.func @transform_3(%arg0: i32) -> (i32, i32) {
    %c0_i32 = arith.constant 0 : i32
    %c0_i32_0 = arith.constant 0 : i32
    %c0_i32_1 = arith.constant 0 : i32
    return %c0_i32, %c0_i32_0 : i32, i32
  }
  func.func @transform_4(%arg0: i32) -> (i32, i32) {
    %c0_i32 = arith.constant 0 : i32
    %c0_i32_0 = arith.constant 0 : i32
    %c0_i32_1 = arith.constant 0 : i32
    return %c0_i32, %c0_i32_0 : i32, i32
  }
  func.func @transform_5(%arg0: i32) -> (i32, i32) {
    %c0_i32 = arith.constant 0 : i32
    %c0_i32_0 = arith.constant 0 : i32
    %c0_i32_1 = arith.constant 0 : i32
    return %c0_i32, %c0_i32_0 : i32, i32
  }
  func.func @transform_6(%arg0: i32) -> (i32, i32) {
    %c0_i32 = arith.constant 0 : i32
    %c0_i32_0 = arith.constant 0 : i32
    %c0_i32_1 = arith.constant 0 : i32
    return %c0_i32, %c0_i32_0 : i32, i32
  }
  func.func @transform_7(%arg0: i32) -> (i32, i32) {
    %c0_i32 = arith.constant 0 : i32
    %c0_i32_0 = arith.constant 0 : i32
    %c0_i32_1 = arith.constant 0 : i32
    return %c0_i32, %c0_i32_0 : i32, i32
  }
  func.func @transform_8(%arg0: i32) -> (i32, i32) {
    %c0_i32 = arith.constant 0 : i32
    %c0_i32_0 = arith.constant 0 : i32
    return %arg0, %c0_i32 : i32, i32
  }
}

module attributes {stable_mosaic.version = 11 : i64} {
  func.func @focuser_kernel(%arg0: i32, %arg1: memref<8x784xf32, #tpu.memory_space<vmem>>, %arg2: memref<784x256xf32, #tpu.memory_space<vmem>>, %arg3: memref<1x256xf32, #tpu.memory_space<vmem>>, %arg4: memref<256x128xf32, #tpu.memory_space<vmem>>, %arg5: memref<1x128xf32, #tpu.memory_space<vmem>>, %arg6: memref<128x64xf32, #tpu.memory_space<vmem>>, %arg7: memref<1x64xf32, #tpu.memory_space<vmem>>, %arg8: memref<64x784xf32, #tpu.memory_space<vmem>>, %arg9: memref<8x784xf32, #tpu.memory_space<vmem>>) attributes {dimension_semantics = [#tpu.dimension_semantics<parallel>], iteration_bounds = array<i64: 1>, scalar_prefetch = 0 : i64, scratch_operands = 0 : i64, tpu.core_type = #tpu.core_type<tc>, window_params = [{transform_indices = @transform_0, window_bounds = array<i64: 8, 784>}, {pipeline_mode = #tpu.pipeline_mode<synchronous>, transform_indices = @transform_1, window_bounds = array<i64: 784, 256>}, {pipeline_mode = #tpu.pipeline_mode<synchronous>, transform_indices = @transform_2, window_bounds = array<i64: 1, 256>}, {pipeline_mode = #tpu.pipeline_mode<synchronous>, transform_indices = @transform_3, window_bounds = array<i64: 256, 128>}, {pipeline_mode = #tpu.pipeline_mode<synchronous>, transform_indices = @transform_4, window_bounds = array<i64: 1, 128>}, {pipeline_mode = #tpu.pipeline_mode<synchronous>, transform_indices = @transform_5, window_bounds = array<i64: 128, 64>}, {pipeline_mode = #tpu.pipeline_mode<synchronous>, transform_indices = @transform_6, window_bounds = array<i64: 1, 64>}, {pipeline_mode = #tpu.pipeline_mode<synchronous>, transform_indices = @transform_7, window_bounds = array<i64: 64, 784>}, {transform_indices = @transform_8, window_bounds = array<i64: 8, 784>}]} {
    %c0 = arith.constant 0 : index
    %c0_0 = arith.constant 0 : index
    %0 = vector.load %arg1[%c0, %c0_0] : memref<8x784xf32, #tpu.memory_space<vmem>>, vector<8x784xf32>
    %c0_1 = arith.constant 0 : index
    %c0_2 = arith.constant 0 : index
    %1 = vector.load %arg2[%c0_1, %c0_2] : memref<784x256xf32, #tpu.memory_space<vmem>>, vector<784x256xf32>
    %cst = arith.constant dense<0.000000e+00> : vector<8x256xf32>
    %2 = tpu.matmul %0, %1, %cst {dimension_numbers = #tpu.dot_dimension_numbers<[1], [0], [0], [1], [0, 0, 1, 1], [], []>} : vector<8x784xf32>, vector<784x256xf32>, vector<8x256xf32> -> vector<8x256xf32>
    %c0_3 = arith.constant 0 : index
    %c0_4 = arith.constant 0 : index
    %3 = vector.load %arg3[%c0_3, %c0_4] : memref<1x256xf32, #tpu.memory_space<vmem>>, vector<1x256xf32>
    %4 = vector.broadcast %3 : vector<1x256xf32> to vector<8x256xf32>
    %5 = arith.addf %2, %4 : vector<8x256xf32>
    %cst_5 = arith.constant 0.000000e+00 : f32
    %6 = vector.broadcast %cst_5 : f32 to vector<8x256xf32>
    %7 = arith.maximumf %5, %6 : vector<8x256xf32>
    %c0_6 = arith.constant 0 : index
    %c0_7 = arith.constant 0 : index
    %8 = vector.load %arg4[%c0_6, %c0_7] : memref<256x128xf32, #tpu.memory_space<vmem>>, vector<256x128xf32>
    %cst_8 = arith.constant dense<0.000000e+00> : vector<8x128xf32>
    %9 = tpu.matmul %7, %8, %cst_8 {dimension_numbers = #tpu.dot_dimension_numbers<[1], [0], [0], [1], [0, 0, 1, 1], [], []>} : vector<8x256xf32>, vector<256x128xf32>, vector<8x128xf32> -> vector<8x128xf32>
    %c0_9 = arith.constant 0 : index
    %c0_10 = arith.constant 0 : index
    %10 = vector.load %arg5[%c0_9, %c0_10] : memref<1x128xf32, #tpu.memory_space<vmem>>, vector<1x128xf32>
    %11 = vector.broadcast %10 : vector<1x128xf32> to vector<8x128xf32>
    %12 = arith.addf %9, %11 : vector<8x128xf32>
    %cst_11 = arith.constant 0.000000e+00 : f32
    %13 = vector.broadcast %cst_11 : f32 to vector<8x128xf32>
    %14 = arith.maximumf %12, %13 : vector<8x128xf32>
    %c0_12 = arith.constant 0 : index
    %c0_13 = arith.constant 0 : index
    %15 = vector.load %arg6[%c0_12, %c0_13] : memref<128x64xf32, #tpu.memory_space<vmem>>, vector<128x64xf32>
    %cst_14 = arith.constant dense<0.000000e+00> : vector<8x64xf32>
    %16 = tpu.matmul %14, %15, %cst_14 {dimension_numbers = #tpu.dot_dimension_numbers<[1], [0], [0], [1], [0, 0, 1, 1], [], []>} : vector<8x128xf32>, vector<128x64xf32>, vector<8x64xf32> -> vector<8x64xf32>
    %c0_15 = arith.constant 0 : index
    %c0_16 = arith.constant 0 : index
    %17 = vector.load %arg7[%c0_15, %c0_16] : memref<1x64xf32, #tpu.memory_space<vmem>>, vector<1x64xf32>
    %18 = vector.broadcast %17 : vector<1x64xf32> to vector<8x64xf32>
    %19 = arith.addf %16, %18 : vector<8x64xf32>
    %20 = arith.negf %19 : vector<8x64xf32>
    %21 = math.exp %20 : vector<8x64xf32>
    %cst_17 = arith.constant 1.000000e+00 : f32
    %22 = vector.broadcast %cst_17 : f32 to vector<8x64xf32>
    %23 = arith.addf %22, %21 : vector<8x64xf32>
    %24 = arith.divf %22, %23 : vector<8x64xf32>
    %c0_18 = arith.constant 0 : index
    %c0_19 = arith.constant 0 : index
    %25 = vector.load %arg8[%c0_18, %c0_19] : memref<64x784xf32, #tpu.memory_space<vmem>>, vector<64x784xf32>
    %cst_20 = arith.constant dense<0.000000e+00> : vector<8x784xf32>
    %26 = tpu.matmul %24, %25, %cst_20 {dimension_numbers = #tpu.dot_dimension_numbers<[1], [0], [0], [1], [0, 0, 1, 1], [], []>} : vector<8x64xf32>, vector<64x784xf32>, vector<8x784xf32> -> vector<8x784xf32>
    %c0_21 = arith.constant 0 : index
    %c0_22 = arith.constant 0 : index
    %27 = vector.load %arg9[%c0_21, %c0_22] : memref<8x784xf32, #tpu.memory_space<vmem>>, vector<8x784xf32>
    tpu.vector_store %arg9[%c0_21, %c0_22], %26 {strides = array<i32>} : memref<8x784xf32, #tpu.memory_space<vmem>>, vector<8x784xf32>,
    return
  }
  func.func @transform_0(%arg0: i32) -> (i32, i32) {
    %c0_i32 = arith.constant 0 : i32
    %c0_i32_0 = arith.constant 0 : i32
    return %arg0, %c0_i32 : i32, i32
  }
  func.func @transform_1(%arg0: i32) -> (i32, i32) {
    %c0_i32 = arith.constant 0 : i32
    %c0_i32_0 = arith.constant 0 : i32
    %c0_i32_1 = arith.constant 0 : i32
    return %c0_i32, %c0_i32_0 : i32, i32
  }
  func.func @transform_2(%arg0: i32) -> (i32, i32) {
    %c0_i32 = arith.constant 0 : i32
    %c0_i32_0 = arith.constant 0 : i32
    %c0_i32_1 = arith.constant 0 : i32
    return %c0_i32, %c0_i32_0 : i32, i32
  }
  func.func @transform_3(%arg0: i32) -> (i32, i32) {
    %c0_i32 = arith.constant 0 : i32
    %c0_i32_0 = arith.constant 0 : i32
    %c0_i32_1 = arith.constant 0 : i32
    return %c0_i32, %c0_i32_0 : i32, i32
  }
  func.func @transform_4(%arg0: i32) -> (i32, i32) {
    %c0_i32 = arith.constant 0 : i32
    %c0_i32_0 = arith.constant 0 : i32
    %c0_i32_1 = arith.constant 0 : i32
    return %c0_i32, %c0_i32_0 : i32, i32
  }
  func.func @transform_5(%arg0: i32) -> (i32, i32) {
    %c0_i32 = arith.constant 0 : i32
    %c0_i32_0 = arith.constant 0 : i32
    %c0_i32_1 = arith.constant 0 : i32
    return %c0_i32, %c0_i32_0 : i32, i32
  }
  func.func @transform_6(%arg0: i32) -> (i32, i32) {
    %c0_i32 = arith.constant 0 : i32
    %c0_i32_0 = arith.constant 0 : i32
    %c0_i32_1 = arith.constant 0 : i32
    return %c0_i32, %c0_i32_0 : i32, i32
  }
  func.func @transform_7(%arg0: i32) -> (i32, i32) {
    %c0_i32 = arith.constant 0 : i32
    %c0_i32_0 = arith.constant 0 : i32
    %c0_i32_1 = arith.constant 0 : i32
    return %c0_i32, %c0_i32_0 : i32, i32
  }
  func.func @transform_8(%arg0: i32) -> (i32, i32) {
    %c0_i32 = arith.constant 0 : i32
    %c0_i32_0 = arith.constant 0 : i32
    return %arg0, %c0_i32 : i32, i32
  }
}

</mosaic_0001>

<bundles_post_ra>
// kernel: tpu_custom_call.1
= control target key start
LH: loop header
LB: loop body
LE: loop exit
PB: predicated region body
PF: predicated region fallthrough
CT: control target
= control target key end

     0   :  { %13 = vsyncpa [#allocation3], 0  ;;  %s1561_s0 = inlined_call_operand.vmem [shape: f32[8,784], index: 0, kind: input, shape index: {}]   ;;  %s1562_s1 = inlined_call_operand.hbm [shape: f32[784,256], index: 1, kind: input, shape index: {}]   ;;  %s1563_s2 = inlined_call_operand.vmem [shape: f32[1,256], index: 2, kind: input, shape index: {}]   ;;  %s1564_s3 = inlined_call_operand.hbm [shape: f32[256,128], index: 3, kind: input, shape index: {}]   ;;  %s1565_s4 = inlined_call_operand.vmem [shape: f32[1,128], index: 4, kind: input, shape index: {}]   ;;  %s1566_s5 = inlined_call_operand.vmem [shape: f32[128,64], index: 5, kind: input, shape index: {}]   ;;  %s1567_s6 = inlined_call_operand.vmem [shape: f32[1,64], index: 6, kind: input, shape index: {}]   ;;  %s1568_s7 = inlined_call_operand.hbm [shape: f32[64,784], index: 7, kind: input, shape index: {}]   ;;  %s1569_s8 = inlined_call_operand.hbm [shape: f32[8,784], index: 8, kind: output, shape index: {}]  }
   0x1   :  { %14 = vsyncpa [#allocation6], 0 }
   0x2   :  { %15 = vsyncpa [#allocation4], 0  ;;  %s1376_s27 = smov [#allocation5]  }
   0x3   :  { %s37_s28 = sshll.u32 %s1376_s27, 4  ;;  %s38_s28 = int_to_ptr.vmem [resolvable:$true] %s37_s28 }
   0x4   :  { %s1298_s29 = scalar_lea.vmem %s38_s28, 4096  ;;  %p1303_p1 = scmp.lt.s32.totalorder %s38_s28, %s38_s28 }
   0x5   :  { %p1299_p0 = scmp.ne.s32.totalorder %s38_s28, %s1298_s29  ;;  %p1304_p2 = scmp.lt.s32.totalorder %s1298_s29, %s1298_s29 }
   0x7   :  { %p1305_p3 = por %p1304_p2, %p1303_p1 }
   0x9   :  { %p1306_p4 = pnand %p1305_p3, %p1299_p0 }
   0xb   :  { %1309 = shalt.err (!%p1306_p4)
}
   0xc   :  { %s1377_s30 = smov 128   ;;  %s1378_s9 = smov 8  }
   0xd   :  { %43 = dma.hbm_to_vmem [thread:$0]  %s1564_s3, 4096, %s38_s28, [#allocation6], %s1377_s30, %s1377_s30, %s1378_s9  }
   0xe   :  { %s1379_s12 = smov [#allocation2]  }
   0xf   :  { %s23_s13 = sshll.u32 %s1379_s12, 4  ;;  %s24_s13 = int_to_ptr.vmem [resolvable:$true] %s23_s13 }
  0x10   :  { %s1318_s14 = scalar_lea.vmem %s24_s13, 25088  ;;  %p1323_p6 = scmp.lt.s32.totalorder %s24_s13, %s24_s13 }
  0x11   :  { %p1319_p5 = scmp.ne.s32.totalorder %s24_s13, %s1318_s14  ;;  %p1324_p7 = scmp.lt.s32.totalorder %s1318_s14, %s1318_s14 }
  0x13   :  { %p1325_p8 = por %p1324_p7, %p1323_p6 }
  0x15   :  { %p1326_p9 = pnand %p1325_p8, %p1319_p5 }
  0x17   :  { %1329 = shalt.err (!%p1326_p9)
}
  0x18   :  { %s1380_s15 = smov 256   ;;  %s1381_s16 = smov 16  }
  0x19   :  { %29 = dma.hbm_to_vmem [thread:$0]  %s1562_s1, 25088, %s24_s13, [#allocation3], %s1380_s15, %s1380_s15, %s1381_s16  }
  0x1a   :  { %s1382_s19 = smov [#allocation7]  }
  0x1b   :  { %s55_s20 = sshll.u32 %s1382_s19, 4  ;;  %s56_s20 = int_to_ptr.vmem [resolvable:$true] %s55_s20 }
  0x1c   :  { %s1338_s3 = scalar_lea.vmem %s56_s20, 7168  ;;  %p1343_p11 = scmp.lt.s32.totalorder %s56_s20, %s56_s20 }
  0x1d   :  { %p1339_p10 = scmp.ne.s32.totalorder %s56_s20, %s1338_s3  ;;  %p1344_p12 = scmp.lt.s32.totalorder %s1338_s3, %s1338_s3 }
  0x1f   :  { %p1345_p13 = por %p1344_p12, %p1343_p11 }
  0x21   :  { %p1346_p0 = pnand %p1345_p13, %p1339_p10 }
  0x23   :  { %1349 = shalt.err (!%p1346_p0)
}
  0x24   :  { %s1383_s21 = smov 896   ;;  %s1384_s22 = smov 56  }
  0x25   :  { %61 = dma.hbm_to_vmem [thread:$0]  %s1568_s7, 7168, %s56_s20, [#allocation6], %s1383_s21, %s1383_s21, %s1384_s22  }
  0x26   :  { %1370 = dma.done.wait [#allocation3], 25088  }
  0x27   :  { %1371 = vsyncadd [#allocation3], 4294942208 }
  0x28   :  { %1372 = dma.done.wait [#allocation6], 11264  }
  0x29   :  { %1373 = vsyncadd [#allocation6], 4294956032  ;;  %v109_v0 = vld [vmem:[#allocation2 + $0xf8] sm:$0xff]  ;;  %v108_v1 = vld [vmem:[#allocation2 + $0xf0] sm:$0xff]  ;;  %vm286_vm0 = vcmask 130048   ;;  %vm1386_vm1 = vmmov 0  }
  0x2a   :  { %v107_v2 = vld [vmem:[#allocation2 + $0xe8] sm:$0xff]  ;;  %290 = vmatprep.subr.mxu0 %v109_v0  ;;  %v173_v3 = vld [vmem:[#allocation2 + $0x2f8] sm:$0xff]  ;;  %v106_v4 = vld [vmem:[#allocation2 + $0xe0] sm:$0xff]  ;;  %vm841_vm2 = vcmask 523264  }
  0x2b   :  { %v172_v5 = vld [vmem:[#allocation2 + $0x2f0] sm:$0xff]  ;;  %291 = vmatpush1.msra.mxu0 %v108_v1  ;;  %361 = vmatprep.subr.mxu1 %v173_v3  ;;  %v105_v6 = vld [vmem:[#allocation2 + $0xd8] sm:$0xff]  ;;  %v171_v7 = vld [vmem:[#allocation2 + $0x2e8] sm:$0xff] }
  0x2c   :  { %292 = vmatprep.subr.mxu0 %v107_v2  ;;  %362 = vmatpush1.msra.mxu1 %v172_v5  ;;  %v104_v8 = vld [vmem:[#allocation2 + $0xd0] sm:$0xff]  ;;  %v170_v9 = vld [vmem:[#allocation2 + $0x2e0] sm:$0xff]  ;;  %v169_v10 = vld [vmem:[#allocation2 + $0x2d8] sm:$0xff] }
  0x2d   :  { %293 = vmatpush1.msra.mxu0 %v106_v4  ;;  %363 = vmatprep.subr.mxu1 %v171_v7  ;;  %v103_v11 = vld [vmem:[#allocation2 + $0xc8] sm:$0xff]  ;;  %v168_v12 = vld [vmem:[#allocation2 + $0x2d0] sm:$0xff]  ;;  %v102_v13 = vld [vmem:[#allocation2 + $0xc0] sm:$0xff] }
  0x2e   :  { %294 = vmatprep.subr.mxu0 %v105_v6  ;;  %364 = vmatpush1.msra.mxu1 %v170_v9  ;;  %v167_v14 = vld [vmem:[#allocation2 + $0x2c8] sm:$0xff]  ;;  %v101_v15 = vld [vmem:[#allocation2 + $0xb8] sm:$0xff]  ;;  %v166_v16 = vld [vmem:[#allocation2 + $0x2c0] sm:$0xff] }
  0x2f   :  { %295 = vmatpush1.msra.mxu0 %v104_v8  ;;  %365 = vmatprep.subr.mxu1 %v169_v10  ;;  %v100_v17 = vld [vmem:[#allocation2 + $0xb0] sm:$0xff]  ;;  %v165_v18 = vld [vmem:[#allocation2 + $0x2b8] sm:$0xff]  ;;  %v99_v19 = vld [vmem:[#allocation2 + $0xa8] sm:$0xff] }
  0x30   :  { %296 = vmatprep.subr.mxu0 %v103_v11  ;;  %366 = vmatpush1.msra.mxu1 %v168_v12  ;;  %v164_v20 = vld [vmem:[#allocation2 + $0x2b0] sm:$0xff]  ;;  %v98_v21 = vld [vmem:[#allocation2 + $0xa0] sm:$0xff]  ;;  %v163_v22 = vld [vmem:[#allocation2 + $0x2a8] sm:$0xff] }
  0x31   :  { %297 = vmatpush1.msra.mxu0 %v102_v13  ;;  %367 = vmatprep.subr.mxu1 %v167_v14  ;;  %v97_v23 = vld [vmem:[#allocation2 + $0x98] sm:$0xff]  ;;  %v162_v24 = vld [vmem:[#allocation2 + $0x2a0] sm:$0xff]  ;;  %v96_v25 = vld [vmem:[#allocation2 + $0x90] sm:$0xff] }
  0x32   :  { %298 = vmatprep.subr.mxu0 %v101_v15  ;;  %368 = vmatpush1.msra.mxu1 %v166_v16  ;;  %v161_v26 = vld [vmem:[#allocation2 + $0x298] sm:$0xff]  ;;  %v95_v27 = vld [vmem:[#allocation2 + $0x88] sm:$0xff]  ;;  %v160_v28 = vld [vmem:[#allocation2 + $0x290] sm:$0xff] }
  0x33   :  { %299 = vmatpush1.msra.mxu0 %v100_v17  ;;  %369 = vmatprep.subr.mxu1 %v165_v18  ;;  %v94_v29 = vld [vmem:[#allocation2 + $0x80] sm:$0xff]  ;;  %v159_v30 = vld [vmem:[#allocation2 + $0x288] sm:$0xff]  ;;  %v93_v31 = vld [vmem:[#allocation2 + $0x78] sm:$0xff] }
  0x34   :  { %300 = vmatprep.subr.mxu0 %v99_v19  ;;  %370 = vmatpush1.msra.mxu1 %v164_v20  ;;  %v158_v32 = vld [vmem:[#allocation2 + $0x280] sm:$0xff]  ;;  %v92_v33 = vld [vmem:[#allocation2 + $0x70] sm:$0xff]  ;;  %v157_v34 = vld [vmem:[#allocation2 + $0x278] sm:$0xff] }
  0x35   :  { %301 = vmatpush1.msra.mxu0 %v98_v21  ;;  %371 = vmatprep.subr.mxu1 %v163_v22  ;;  %v91_v35 = vld [vmem:[#allocation2 + $0x68] sm:$0xff]  ;;  %v156_v36 = vld [vmem:[#allocation2 + $0x270] sm:$0xff]  ;;  %v90_v37 = vld [vmem:[#allocation2 + $0x60] sm:$0xff] }
  0x36   :  { %302 = vmatprep.subr.mxu0 %v97_v23  ;;  %372 = vmatpush1.msra.mxu1 %v162_v24  ;;  %v155_v38 = vld [vmem:[#allocation2 + $0x268] sm:$0xff]  ;;  %v89_v39 = vld [vmem:[#allocation2 + $0x58] sm:$0xff]  ;;  %v154_v40 = vld [vmem:[#allocation2 + $0x260] sm:$0xff] }
  0x37   :  { %303 = vmatpush1.msra.mxu0 %v96_v25  ;;  %373 = vmatprep.subr.mxu1 %v161_v26  ;;  %v88_v41 = vld [vmem:[#allocation2 + $0x50] sm:$0xff]  ;;  %v153_v42 = vld [vmem:[#allocation2 + $0x258] sm:$0xff]  ;;  %v87_v43 = vld [vmem:[#allocation2 + $0x48] sm:$0xff] }
  0x38   :  { %304 = vmatprep.subr.mxu0 %v95_v27  ;;  %374 = vmatpush1.msra.mxu1 %v160_v28  ;;  %v152_v44 = vld [vmem:[#allocation2 + $0x250] sm:$0xff]  ;;  %v86_v45 = vld [vmem:[#allocation2 + $0x40] sm:$0xff]  ;;  %v151_v46 = vld [vmem:[#allocation2 + $0x248] sm:$0xff] }
  0x39   :  { %305 = vmatpush1.msra.mxu0 %v94_v29  ;;  %375 = vmatprep.subr.mxu1 %v159_v30  ;;  %v85_v47 = vld [vmem:[#allocation2 + $0x38] sm:$0xff]  ;;  %v150_v48 = vld [vmem:[#allocation2 + $0x240] sm:$0xff]  ;;  %v84_v49 = vld [vmem:[#allocation2 + $0x30] sm:$0xff] }
  0x3a   :  { %306 = vmatprep.subr.mxu0 %v93_v31  ;;  %376 = vmatpush1.msra.mxu1 %v158_v32  ;;  %v149_v50 = vld [vmem:[#allocation2 + $0x238] sm:$0xff]  ;;  %v83_v51 = vld [vmem:[#allocation2 + $0x28] sm:$0xff]  ;;  %v148_v52 = vld [vmem:[#allocation2 + $0x230] sm:$0xff] }
  0x3b   :  { %307 = vmatpush1.msra.mxu0 %v92_v33  ;;  %377 = vmatprep.subr.mxu1 %v157_v34  ;;  %v82_v53 = vld [vmem:[#allocation2 + $0x20] sm:$0xff]  ;;  %v147_v54 = vld [vmem:[#allocation2 + $0x228] sm:$0xff]  ;;  %v81_v55 = vld [vmem:[#allocation2 + $0x18] sm:$0xff] }
  0x3c   :  { %308 = vmatprep.subr.mxu0 %v91_v35  ;;  %378 = vmatpush1.msra.mxu1 %v156_v36  ;;  %v146_v56 = vld [vmem:[#allocation2 + $0x220] sm:$0xff]  ;;  %v80_v57 = vld [vmem:[#allocation2 + $0x10] sm:$0xff]  ;;  %v145_v58 = vld [vmem:[#allocation2 + $0x218] sm:$0xff] }
  0x3d   :  { %309 = vmatpush1.msra.mxu0 %v90_v37  ;;  %379 = vmatprep.subr.mxu1 %v155_v38  ;;  %v79_v59 = vld [vmem:[#allocation2 + $0x8] sm:$0xff]  ;;  %v144_v60 = vld [vmem:[#allocation2 + $0x210] sm:$0xff]  ;;  %v78_v61 = vld [vmem:[#allocation2] sm:$0xff] }
  0x3e   :  { %310 = vmatprep.subr.mxu0 %v89_v39  ;;  %380 = vmatpush1.msra.mxu1 %v154_v40  ;;  %v143_v62 = vld [vmem:[#allocation2 + $0x208] sm:$0xff]  ;;  %v141_v63 = vld [vmem:[#allocation2 + $0x1f8] sm:$0xff]  ;;  %v142_v0 = vld [vmem:[#allocation2 + $0x200] sm:$0xff] }
  0x3f   :  { %311 = vmatpush1.msra.mxu0 %v88_v41  ;;  %381 = vmatprep.subr.mxu1 %v153_v42  ;;  %v140_v1 = vld [vmem:[#allocation2 + $0x1f0] sm:$0xff]  ;;  %v205_v2 = vld [vmem:[#allocation2 + $0x3f8] sm:$0xff]  ;;  %v139_v3 = vld [vmem:[#allocation2 + $0x1e8] sm:$0xff] }
  0x40   :  { %312 = vmatprep.subr.mxu0 %v87_v43  ;;  %382 = vmatpush1.msra.mxu1 %v152_v44  ;;  %v204_v4 = vld [vmem:[#allocation2 + $0x3f0] sm:$0xff]  ;;  %v138_v5 = vld [vmem:[#allocation2 + $0x1e0] sm:$0xff]  ;;  %v203_v6 = vld [vmem:[#allocation2 + $0x3e8] sm:$0xff] }
  0x41   :  { %313 = vmatpush1.msra.mxu0 %v86_v45  ;;  %383 = vmatprep.subr.mxu1 %v151_v46  ;;  %v137_v7 = vld [vmem:[#allocation2 + $0x1d8] sm:$0xff]  ;;  %v202_v8 = vld [vmem:[#allocation2 + $0x3e0] sm:$0xff]  ;;  %v136_v9 = vld [vmem:[#allocation2 + $0x1d0] sm:$0xff] }
  0x42   :  { %314 = vmatprep.subr.mxu0 %v85_v47  ;;  %384 = vmatpush1.msra.mxu1 %v150_v48  ;;  %v201_v10 = vld [vmem:[#allocation2 + $0x3d8] sm:$0xff]  ;;  %v135_v11 = vld [vmem:[#allocation2 + $0x1c8] sm:$0xff]  ;;  %v200_v12 = vld [vmem:[#allocation2 + $0x3d0] sm:$0xff] }
  0x43   :  { %315 = vmatpush1.msra.mxu0 %v84_v49  ;;  %385 = vmatprep.subr.mxu1 %v149_v50  ;;  %v134_v13 = vld [vmem:[#allocation2 + $0x1c0] sm:$0xff]  ;;  %v199_v14 = vld [vmem:[#allocation2 + $0x3c8] sm:$0xff]  ;;  %v133_v15 = vld [vmem:[#allocation2 + $0x1b8] sm:$0xff] }
  0x44   :  { %316 = vmatprep.subr.mxu0 %v83_v51  ;;  %386 = vmatpush1.msra.mxu1 %v148_v52  ;;  %v198_v16 = vld [vmem:[#allocation2 + $0x3c0] sm:$0xff]  ;;  %v132_v17 = vld [vmem:[#allocation2 + $0x1b0] sm:$0xff]  ;;  %v197_v18 = vld [vmem:[#allocation2 + $0x3b8] sm:$0xff] }
  0x45   :  { %317 = vmatpush1.msra.mxu0 %v82_v53  ;;  %387 = vmatprep.subr.mxu1 %v147_v54  ;;  %v131_v19 = vld [vmem:[#allocation2 + $0x1a8] sm:$0xff]  ;;  %v196_v20 = vld [vmem:[#allocation2 + $0x3b0] sm:$0xff]  ;;  %v130_v21 = vld [vmem:[#allocation2 + $0x1a0] sm:$0xff] }
  0x46   :  { %318 = vmatprep.subr.mxu0 %v81_v55  ;;  %388 = vmatpush1.msra.mxu1 %v146_v56  ;;  %v195_v22 = vld [vmem:[#allocation2 + $0x3a8] sm:$0xff]  ;;  %v129_v23 = vld [vmem:[#allocation2 + $0x198] sm:$0xff]  ;;  %v194_v24 = vld [vmem:[#allocation2 + $0x3a0] sm:$0xff] }
  0x47   :  { %319 = vmatpush1.msra.mxu0 %v80_v57  ;;  %389 = vmatprep.subr.mxu1 %v145_v58  ;;  %v128_v25 = vld [vmem:[#allocation2 + $0x190] sm:$0xff]  ;;  %v193_v26 = vld [vmem:[#allocation2 + $0x398] sm:$0xff]  ;;  %v127_v27 = vld [vmem:[#allocation2 + $0x188] sm:$0xff] }
  0x48   :  { %320 = vmatprep.subr.mxu0 %v79_v59  ;;  %390 = vmatpush1.msra.mxu1 %v144_v60  ;;  %v192_v28 = vld [vmem:[#allocation2 + $0x390] sm:$0xff]  ;;  %v126_v29 = vld [vmem:[#allocation2 + $0x180] sm:$0xff]  ;;  %v191_v30 = vld [vmem:[#allocation2 + $0x388] sm:$0xff] }
  0x49   :  { %321 = vmatpush1.msra.mxu0 %v78_v61  ;;  %391 = vmatprep.subr.mxu1 %v143_v62  ;;  %v125_v31 = vld [vmem:[#allocation2 + $0x178] sm:$0xff]  ;;  %v190_v32 = vld [vmem:[#allocation2 + $0x380] sm:$0xff]  ;;  %v124_v33 = vld [vmem:[#allocation2 + $0x170] sm:$0xff] }
  0x4a   :  { %322 = vmatprep.subr.mxu0 %v141_v63  ;;  %392 = vmatpush1.msra.mxu1 %v142_v0  ;;  %v189_v34 = vld [vmem:[#allocation2 + $0x378] sm:$0xff]  ;;  %v123_v35 = vld [vmem:[#allocation2 + $0x168] sm:$0xff]  ;;  %v188_v36 = vld [vmem:[#allocation2 + $0x370] sm:$0xff] }
  0x4b   :  { %323 = vmatpush2.msra.mxu0 %v140_v1  ;;  %393 = vmatprep.subr.mxu1 %v205_v2  ;;  %v122_v37 = vld [vmem:[#allocation2 + $0x160] sm:$0xff]  ;;  %v187_v38 = vld [vmem:[#allocation2 + $0x368] sm:$0xff]  ;;  %v121_v39 = vld [vmem:[#allocation2 + $0x158] sm:$0xff] }
  0x4c   :  { %324 = vmatprep.subr.mxu0 %v139_v3  ;;  %394 = vmatpush2.msra.mxu1 %v204_v4  ;;  %v186_v40 = vld [vmem:[#allocation2 + $0x360] sm:$0xff]  ;;  %v120_v41 = vld [vmem:[#allocation2 + $0x150] sm:$0xff]  ;;  %v185_v42 = vld [vmem:[#allocation2 + $0x358] sm:$0xff] }
  0x4d   :  { %325 = vmatpush2.msra.mxu0 %v138_v5  ;;  %395 = vmatprep.subr.mxu1 %v203_v6  ;;  %v119_v43 = vld [vmem:[#allocation2 + $0x148] sm:$0xff]  ;;  %v184_v44 = vld [vmem:[#allocation2 + $0x350] sm:$0xff]  ;;  %v118_v45 = vld [vmem:[#allocation2 + $0x140] sm:$0xff] }
  0x4e   :  { %326 = vmatprep.subr.mxu0 %v137_v7  ;;  %396 = vmatpush2.msra.mxu1 %v202_v8  ;;  %v183_v46 = vld [vmem:[#allocation2 + $0x348] sm:$0xff]  ;;  %v117_v47 = vld [vmem:[#allocation2 + $0x138] sm:$0xff]  ;;  %v182_v48 = vld [vmem:[#allocation2 + $0x340] sm:$0xff] }
  0x4f   :  { %327 = vmatpush2.msra.mxu0 %v136_v9  ;;  %397 = vmatprep.subr.mxu1 %v201_v10  ;;  %v116_v49 = vld [vmem:[#allocation2 + $0x130] sm:$0xff]  ;;  %v181_v50 = vld [vmem:[#allocation2 + $0x338] sm:$0xff]  ;;  %v115_v51 = vld [vmem:[#allocation2 + $0x128] sm:$0xff] }
  0x50   :  { %328 = vmatprep.subr.mxu0 %v135_v11  ;;  %398 = vmatpush2.msra.mxu1 %v200_v12  ;;  %v180_v52 = vld [vmem:[#allocation2 + $0x330] sm:$0xff]  ;;  %v114_v53 = vld [vmem:[#allocation2 + $0x120] sm:$0xff]  ;;  %v179_v54 = vld [vmem:[#allocation2 + $0x328] sm:$0xff] }
  0x51   :  { %329 = vmatpush2.msra.mxu0 %v134_v13  ;;  %399 = vmatprep.subr.mxu1 %v199_v14  ;;  %v113_v55 = vld [vmem:[#allocation2 + $0x118] sm:$0xff]  ;;  %v178_v56 = vld [vmem:[#allocation2 + $0x320] sm:$0xff]  ;;  %v112_v57 = vld [vmem:[#allocation2 + $0x110] sm:$0xff] }
  0x52   :  { %330 = vmatprep.subr.mxu0 %v133_v15  ;;  %400 = vmatpush2.msra.mxu1 %v198_v16  ;;  %v177_v58 = vld [vmem:[#allocation2 + $0x318] sm:$0xff]  ;;  %v111_v59 = vld [vmem:[#allocation2 + $0x108] sm:$0xff]  ;;  %v110_v61 = vld [vmem:[#allocation2 + $0x100] sm:$0xff] }
  0x53   :  { %331 = vmatpush2.msra.mxu0 %v132_v17  ;;  %401 = vmatprep.subr.mxu1 %v197_v18  ;;  %v72_v60 = vld [vmem:[%s1561_s0 + $0x8] sm:$0xff]  ;;  %v176_v62 = vld [vmem:[#allocation2 + $0x310] sm:$0xff]  ;;  %v71_v63 = vld [vmem:[%s1561_s0] sm:$0xff] }
  0x54   :  { %332 = vmatprep.subr.mxu0 %v131_v19  ;;  %402 = vmatpush2.msra.mxu1 %v196_v20  ;;  %v175_v0 = vld [vmem:[#allocation2 + $0x308] sm:$0xff]  ;;  %v237_v1 = vld [vmem:[#allocation2 + $0x4f8] sm:$0xff]  ;;  %v174_v2 = vld [vmem:[#allocation2 + $0x300] sm:$0xff] }
  0x55   :  { %333 = vmatpush2.msra.mxu0 %v130_v21  ;;  %403 = vmatprep.subr.mxu1 %v195_v22  ;;  %v74_v3 = vld [vmem:[%s1561_s0 + $0x18] sm:$0xff]  ;;  %v236_v4 = vld [vmem:[#allocation2 + $0x4f0] sm:$0xff]  ;;  %v235_v6 = vld [vmem:[#allocation2 + $0x4e8] sm:$0xff]  ;;  %v1385_v22 = vmov 0.0  }
  0x56   :  { %334 = vmatprep.subr.mxu0 %v129_v23  ;;  %404 = vmatpush2.msra.mxu1 %v194_v24  ;;  %v73_v5 = vld [vmem:[%s1561_s0 + $0x10] sm:$0xff]  ;;  %v234_v7 = vld [vmem:[#allocation2 + $0x4e0] sm:$0xff]  ;;  %v273_v8 = vld [vmem:[#allocation2 + $0x618] sm:$0xff] }
  0x57   :  { %335 = vmatpush2.msra.mxu0 %v128_v25  ;;  %405 = vmatprep.subr.mxu1 %v193_v26  ;;  %v233_v9 = vld [vmem:[#allocation2 + $0x4d8] sm:$0xff]  ;;  %v272_v10 = vld [vmem:[#allocation2 + $0x610] sm:$0xff]  ;;  %v271_v12 = vld [vmem:[#allocation2 + $0x608] sm:$0xff] }
  0x58   :  { %336 = vmatprep.subr.mxu0 %v127_v27  ;;  %406 = vmatpush2.msra.mxu1 %v192_v28  ;;  %v232_v11 = vld [vmem:[#allocation2 + $0x4d0] sm:$0xff]  ;;  %v231_v13 = vld [vmem:[#allocation2 + $0x4c8] sm:$0xff]  ;;  %v230_v15 = vld [vmem:[#allocation2 + $0x4c0] sm:$0xff] }
  0x59   :  { %337 = vmatpush2.msra.mxu0 %v126_v29  ;;  %407 = vmatprep.subr.mxu1 %v191_v30  ;;  %v76_v14 = vld [vmem:[%s1561_s0 + $0x28] sm:$0xff]  ;;  %v270_v16 = vld [vmem:[#allocation2 + $0x600] sm:$0xff]  ;;  %v229_v17 = vld [vmem:[#allocation2 + $0x4b8] sm:$0xff] }
  0x5a   :  { %338 = vmatprep.subr.mxu0 %v125_v31  ;;  %408 = vmatpush2.msra.mxu1 %v190_v32  ;;  %v228_v18 = vld [vmem:[#allocation2 + $0x4b0] sm:$0xff]  ;;  %v227_v20 = vld [vmem:[#allocation2 + $0x4a8] sm:$0xff]  ;;  %v226_v21 = vld [vmem:[#allocation2 + $0x4a0] sm:$0xff] }
  0x5b   :  { %339 = vmatpush2.msra.mxu0 %v124_v33  ;;  %409 = vmatprep.subr.mxu1 %v189_v34  ;;  %v77_v19 = vld [vmem:[%s1561_s0 + $0x30] sm:$0xff]  ;;  %v225_v23 = vld [vmem:[#allocation2 + $0x498] sm:$0xff]  ;;  %v223_v25 = vld [vmem:[#allocation2 + $0x488] sm:$0xff] }
  0x5c   :  { %340 = vmatprep.subr.mxu0 %v123_v35  ;;  %410 = vmatpush2.msra.mxu1 %v188_v36  ;;  %v224_v24 = vld [vmem:[#allocation2 + $0x490] sm:$0xff]  ;;  %v222_v26 = vld [vmem:[#allocation2 + $0x480] sm:$0xff]  ;;  %v221_v27 = vld [vmem:[#allocation2 + $0x478] sm:$0xff] }
  0x5d   :  { %341 = vmatpush2.msra.mxu0 %v122_v37  ;;  %411 = vmatprep.subr.mxu1 %v187_v38  ;;  %v220_v28 = vld [vmem:[#allocation2 + $0x470] sm:$0xff]  ;;  %v219_v29 = vld [vmem:[#allocation2 + $0x468] sm:$0xff]  ;;  %v218_v30 = vld [vmem:[#allocation2 + $0x460] sm:$0xff] }
  0x5e   :  { %342 = vmatprep.subr.mxu0 %v121_v39  ;;  %412 = vmatpush2.msra.mxu1 %v186_v40  ;;  %v217_v31 = vld [vmem:[#allocation2 + $0x458] sm:$0xff]  ;;  %v216_v32 = vld [vmem:[#allocation2 + $0x450] sm:$0xff]  ;;  %v215_v33 = vld [vmem:[#allocation2 + $0x448] sm:$0xff] }
  0x5f   :  { %343 = vmatpush2.msra.mxu0 %v120_v41  ;;  %413 = vmatprep.subr.mxu1 %v185_v42  ;;  %v214_v34 = vld [vmem:[#allocation2 + $0x440] sm:$0xff]  ;;  %v213_v35 = vld [vmem:[#allocation2 + $0x438] sm:$0xff]  ;;  %v212_v36 = vld [vmem:[#allocation2 + $0x430] sm:$0xff] }
  0x60   :  { %344 = vmatprep.subr.mxu0 %v119_v43  ;;  %414 = vmatpush2.msra.mxu1 %v184_v44  ;;  %v211_v37 = vld [vmem:[#allocation2 + $0x428] sm:$0xff]  ;;  %v210_v38 = vld [vmem:[#allocation2 + $0x420] sm:$0xff]  ;;  %v209_v39 = vld [vmem:[#allocation2 + $0x418] sm:$0xff] }
  0x61   :  { %345 = vmatpush2.msra.mxu0 %v118_v45  ;;  %415 = vmatprep.subr.mxu1 %v183_v46  ;;  %v208_v40 = vld [vmem:[#allocation2 + $0x410] sm:$0xff]  ;;  %v207_v41 = vld [vmem:[#allocation2 + $0x408] sm:$0xff]  ;;  %v206_v42 = vld [vmem:[#allocation2 + $0x400] sm:$0xff] }
  0x62   :  { %346 = vmatprep.subr.mxu0 %v117_v47  ;;  %416 = vmatpush2.msra.mxu1 %v182_v48  ;;  %v269_v43 = vld [vmem:[#allocation2 + $0x5f8] sm:$0xff]  ;;  %v268_v44 = vld [vmem:[#allocation2 + $0x5f0] sm:$0xff]  ;;  %v267_v45 = vld [vmem:[#allocation2 + $0x5e8] sm:$0xff] }
  0x63   :  { %347 = vmatpush2.msra.mxu0 %v116_v49  ;;  %417 = vmatprep.subr.mxu1 %v181_v50  ;;  %v266_v46 = vld [vmem:[#allocation2 + $0x5e0] sm:$0xff]  ;;  %v265_v47 = vld [vmem:[#allocation2 + $0x5d8] sm:$0xff]  ;;  %v264_v48 = vld [vmem:[#allocation2 + $0x5d0] sm:$0xff] }
  0x64   :  { %348 = vmatprep.subr.mxu0 %v115_v51  ;;  %418 = vmatpush2.msra.mxu1 %v180_v52  ;;  %v263_v49 = vld [vmem:[#allocation2 + $0x5c8] sm:$0xff]  ;;  %v262_v50 = vld [vmem:[#allocation2 + $0x5c0] sm:$0xff]  ;;  %v261_v51 = vld [vmem:[#allocation2 + $0x5b8] sm:$0xff] }
  0x65   :  { %349 = vmatpush2.msra.mxu0 %v114_v53  ;;  %419 = vmatprep.subr.mxu1 %v179_v54  ;;  %v260_v52 = vld [vmem:[#allocation2 + $0x5b0] sm:$0xff]  ;;  %v259_v53 = vld [vmem:[#allocation2 + $0x5a8] sm:$0xff]  ;;  %v258_v54 = vld [vmem:[#allocation2 + $0x5a0] sm:$0xff] }
  0x66   :  { %350 = vmatprep.subr.mxu0 %v113_v55  ;;  %420 = vmatpush2.msra.mxu1 %v178_v56  ;;  %v257_v55 = vld [vmem:[#allocation2 + $0x598] sm:$0xff]  ;;  %v256_v56 = vld [vmem:[#allocation2 + $0x590] sm:$0xff] }
  0x67   :  { %351 = vmatpush2.msra.mxu0 %v112_v57  ;;  %421 = vmatprep.subr.mxu1 %v177_v58  ;;  %v255_v57 = vld [vmem:[#allocation2 + $0x588] sm:$0xff]  ;;  %v254_v58 = vld [vmem:[#allocation2 + $0x580] sm:$0xff] }
  0x68   :  { %352 = vmatprep.subr.mxu0 %v111_v59  ;;  %354 = vmatprep.mubr.f32.mxu0 %v72_v60  ;;  %v253_v59 = vld [vmem:[#allocation2 + $0x578] sm:$0xff]  ;;  %v252_v60 = vld [vmem:[#allocation2 + $0x570] sm:$0xff] }
  0x69   :  { %353 = vmatpush2.msra.mxu0 %v110_v61  ;;  %422 = vmatpush2.msra.mxu1 %v176_v62  ;;  %v251_v61 = vld [vmem:[#allocation2 + $0x568] sm:$0xff]  ;;  %v250_v62 = vld [vmem:[#allocation2 + $0x560] sm:$0xff] }
  0x6a   :  { %355 = vmatmul.mubr.f32.vlgmr.msra.gmra.mxu0 %v71_v63  ;;  %423 = vmatprep.subr.mxu1 %v175_v0  ;;  %v249_v63 = vld [vmem:[#allocation2 + $0x558] sm:$0xff]  ;;  %v248_v0 = vld [vmem:[#allocation2 + $0x550] sm:$0xff] }
  0x6b   :  { %432 = vmatprep.subr.mxu0 %v237_v1  ;;  %424 = vmatpush2.msra.mxu1 %v174_v2  ;;  %v247_v1 = vld [vmem:[#allocation2 + $0x548] sm:$0xff]  ;;  %v246_v2 = vld [vmem:[#allocation2 + $0x540] sm:$0xff] }
  0x6c   :  { %425 = vmatprep.mubr.f32.mxu1 %v74_v3  ;;  %433 = vmatpush1.msra.mxu0 %v236_v4  ;;  %v245_v3 = vld [vmem:[#allocation2 + $0x538] sm:$0xff]  ;;  %v244_v4 = vld [vmem:[#allocation2 + $0x530] sm:$0xff] }
  0x6d   :  { %426 = vmatmul.mubr.f32.vlgmr.msra.gmra.mxu1 %v73_v5  ;;  %434 = vmatprep.subr.mxu0 %v235_v6  ;;  %v243_v5 = vld [vmem:[#allocation2 + $0x528] sm:$0xff]  ;;  %v242_v6 = vld [vmem:[#allocation2 + $0x520] sm:$0xff] }
  0x6e   :  { %435 = vmatpush1.msra.mxu0 %v234_v7  ;;  %531 = vmatprep.subr.mxu1 %v273_v8  ;;  %v241_v7 = vld [vmem:[#allocation2 + $0x518] sm:$0xff]  ;;  %v240_v8 = vld [vmem:[#allocation2 + $0x510] sm:$0xff] }
  0x6f   :  { %436 = vmatprep.subr.mxu0 %v233_v9  ;;  %532 = vmatpush1.msra.mxu1 %v272_v10  ;;  %v239_v9 = vld [vmem:[#allocation2 + $0x508] sm:$0xff]  ;;  %v238_v10 = vld [vmem:[#allocation2 + $0x500] sm:$0xff] }
  0x70   :  { %437 = vmatpush1.msra.mxu0 %v232_v11  ;;  %533 = vmatprep.subr.mxu1 %v271_v12  ;;  %v75_v11 = vld [vmem:[%s1561_s0 + $0x20] sm:$0xff]  ;;  %v607_v12 = vld [vmem:[#allocation5 + $0xf8] sm:$0xff] }
  0x71   :  { %438 = vmatprep.subr.mxu0 %v231_v13  ;;  %496 = vmatprep.mubr.f32.mxu0 %v76_v14  ;;  %v591_v13 = vld [vmem:[#allocation5 + $0x78] sm:$0xff]  ;;  %v606_v14 = vld [vmem:[#allocation5 + $0xf0] sm:$0xff] }
  0x72   :  { %439 = vmatpush1.msra.mxu0 %v230_v15  ;;  %534 = vmatpush1.msra.mxu1 %v270_v16  ;;  %v590_v15 = vld [vmem:[#allocation5 + $0x70] sm:$0xff]  ;;  %v605_v16 = vld [vmem:[#allocation5 + $0xe8] sm:$0xff] }
  0x73   :  { %440 = vmatprep.subr.mxu0 %v229_v17  ;;  %567 = vmatprep.mubr.f32.mxu1 %v1385_v22  ;;  %v589_v17 = vld [vmem:[#allocation5 + $0x68] sm:$0xff] }
  0x74   :  { %441 = vmatpush1.msra.mxu0 %v228_v18  ;;  %1151 = vmatmul.mubr.msk.f32.vlgmr.msra.gmra.mxu1 %vm286_vm0, %v77_v19  ;;  %v604_v18 = vld [vmem:[#allocation5 + $0xe0] sm:$0xff] }
  0x75   :  { %442 = vmatprep.subr.mxu0 %v227_v20  ;;  %1159 = vmatprep.subr.mxu1 %v607_v12  ;;  %v588_v19 = vld [vmem:[#allocation5 + $0x60] sm:$0xff]  ;;  %v603_v20 = vld [vmem:[#allocation5 + $0xd8] sm:$0xff]  ;;  %v695_v12 = vld [vmem:[%s1566_s5 + $0x48] sm:$0xff] }
  0x76   :  { %443 = vmatpush1.msra.mxu0 %v226_v21  ;;  %1160 = vmatpush3.msra.mxu1 %v591_v13  ;;  %v587_v21 = vld [vmem:[#allocation5 + $0x58] sm:$0xff]  ;;  %v694_v13 = vld [vmem:[%s1566_s5 + $0x40] sm:$0xff] }
  0x77   :  { %444 = vmatprep.subr.mxu0 %v225_v23  ;;  %1161 = vmatprep.subr.mxu1 %v606_v14  ;;  %v602_v23 = vld [vmem:[#allocation5 + $0xd0] sm:$0xff]  ;;  %v693_v14 = vld [vmem:[%s1566_s5 + $0x38] sm:$0xff] }
  0x78   :  { %445 = vmatpush1.msra.mxu0 %v224_v24  ;;  %1162 = vmatpush3.msra.mxu1 %v590_v15  ;;  %v586_v24 = vld [vmem:[#allocation5 + $0x50] sm:$0xff] }
  0x79   :  { %446 = vmatprep.subr.mxu0 %v223_v25  ;;  %1163 = vmatprep.subr.mxu1 %v605_v16  ;;  %v601_v25 = vld [vmem:[#allocation5 + $0xc8] sm:$0xff]  ;;  %v692_v15 = vld [vmem:[%s1566_s5 + $0x30] sm:$0xff] }
  0x7a   :  { %447 = vmatpush1.msra.mxu0 %v222_v26  ;;  %1164 = vmatpush3.msra.mxu1 %v589_v17  ;;  %v585_v26 = vld [vmem:[#allocation5 + $0x48] sm:$0xff]  ;;  %v690_v17 = vld [vmem:[%s1566_s5 + $0x20] sm:$0xff] }
  0x7b   :  { %448 = vmatprep.subr.mxu0 %v221_v27  ;;  %1165 = vmatprep.subr.mxu1 %v604_v18  ;;  %v600_v27 = vld [vmem:[#allocation5 + $0xc0] sm:$0xff]  ;;  %v691_v16 = vld [vmem:[%s1566_s5 + $0x28] sm:$0xff]  ;;  %v689_v18 = vld [vmem:[%s1566_s5 + $0x18] sm:$0xff] }
  0x7c   :  { %449 = vmatpush1.msra.mxu0 %v220_v28  ;;  %1166 = vmatpush3.msra.mxu1 %v588_v19  ;;  %v584_v28 = vld [vmem:[#allocation5 + $0x40] sm:$0xff]  ;;  %v688_v19 = vld [vmem:[%s1566_s5 + $0x10] sm:$0xff] }
  0x7d   :  { %450 = vmatprep.subr.mxu0 %v219_v29  ;;  %1167 = vmatprep.subr.mxu1 %v603_v20  ;;  %v599_v29 = vld [vmem:[#allocation5 + $0xb8] sm:$0xff]  ;;  %v687_v20 = vld [vmem:[%s1566_s5 + $0x8] sm:$0xff] }
  0x7e   :  { %451 = vmatpush1.msra.mxu0 %v218_v30  ;;  %1168 = vmatpush3.msra.mxu1 %v587_v21  ;;  %v583_v30 = vld [vmem:[#allocation5 + $0x38] sm:$0xff]  ;;  %v686_v21 = vld [vmem:[%s1566_s5] sm:$0xff] }
  0x7f   :  { %452 = vmatprep.subr.mxu0 %v217_v31  ;;  %1169 = vmatprep.subr.mxu1 %v602_v23  ;;  %v598_v31 = vld [vmem:[#allocation5 + $0xb0] sm:$0xff] }
  0x80   :  { %453 = vmatpush1.msra.mxu0 %v216_v32  ;;  %1170 = vmatpush3.msra.mxu1 %v586_v24  ;;  %v582_v32 = vld [vmem:[#allocation5 + $0x30] sm:$0xff]  ;;  %v1152_v24 = vld [vmem:[%s1565_s4] ss:$0 sm:$0xff] }
  0x81   :  { %454 = vmatprep.subr.mxu0 %v215_v33  ;;  %1171 = vmatprep.subr.mxu1 %v601_v25  ;;  %v597_v33 = vld [vmem:[#allocation5 + $0xa8] sm:$0xff] }
  0x82   :  { %455 = vmatpush1.msra.mxu0 %v214_v34  ;;  %1172 = vmatpush3.msra.mxu1 %v585_v26  ;;  %v581_v34 = vld [vmem:[#allocation5 + $0x28] sm:$0xff] }
  0x83   :  { %456 = vmatprep.subr.mxu0 %v213_v35  ;;  %1173 = vmatprep.subr.mxu1 %v600_v27  ;;  %v596_v35 = vld [vmem:[#allocation5 + $0xa0] sm:$0xff] }
  0x84   :  { %457 = vmatpush1.msra.mxu0 %v212_v36  ;;  %1174 = vmatpush3.msra.mxu1 %v584_v28  ;;  %v580_v36 = vld [vmem:[#allocation5 + $0x20] sm:$0xff] }
  0x85   :  { %458 = vmatprep.subr.mxu0 %v211_v37  ;;  %1175 = vmatprep.subr.mxu1 %v599_v29  ;;  %v595_v37 = vld [vmem:[#allocation5 + $0x98] sm:$0xff]  ;;  %v835_v29 = vld [vmem:[#allocation7 + $0x190] sm:$0xff] }
  0x86   :  { %459 = vmatpush1.msra.mxu0 %v210_v38  ;;  %1176 = vmatpush3.msra.mxu1 %v583_v30  ;;  %v579_v38 = vld [vmem:[#allocation5 + $0x18] sm:$0xff]  ;;  %v837_v30 = vld [vmem:[#allocation7 + $0x1a0] sm:$0xff] }
  0x87   :  { %460 = vmatprep.subr.mxu0 %v209_v39  ;;  %1177 = vmatprep.subr.mxu1 %v598_v31  ;;  %v594_v39 = vld [vmem:[#allocation5 + $0x90] sm:$0xff]  ;;  %v834_v31 = vld [vmem:[#allocation7 + $0x188] sm:$0xff] }
  0x88   :  { %461 = vmatpush1.msra.mxu0 %v208_v40  ;;  %1178 = vmatpush3.msra.mxu1 %v582_v32  ;;  %v578_v40 = vld [vmem:[#allocation5 + $0x10] sm:$0xff]  ;;  %v836_v32 = vld [vmem:[#allocation7 + $0x198] sm:$0xff] }
  0x89   :  { %462 = vmatprep.subr.mxu0 %v207_v41  ;;  %1179 = vmatprep.subr.mxu1 %v597_v33  ;;  %v593_v41 = vld [vmem:[#allocation5 + $0x88] sm:$0xff]  ;;  %v828_v33 = vld [vmem:[#allocation7 + $0x158] sm:$0xff] }
  0x8a   :  { %463 = vmatpush1.msra.mxu0 %v206_v42  ;;  %1180 = vmatpush3.msra.mxu1 %v581_v34  ;;  %v577_v42 = vld [vmem:[#allocation5 + $0x8] sm:$0xff] }
  0x8b   :  { %464 = vmatprep.subr.mxu0 %v269_v43  ;;  %1181 = vmatprep.subr.mxu1 %v596_v35  ;;  %v592_v43 = vld [vmem:[#allocation5 + $0x80] sm:$0xff]  ;;  %v830_v34 = vld [vmem:[#allocation7 + $0x168] sm:$0xff]  ;;  %v827_v35 = vld [vmem:[#allocation7 + $0x150] sm:$0xff] }
  0x8c   :  { %465 = vmatpush2.msra.mxu0 %v268_v44  ;;  %1182 = vmatpush3.msra.mxu1 %v580_v36  ;;  %v576_v44 = vld [vmem:[#allocation5] sm:$0xff] }
  0x8d   :  { %466 = vmatprep.subr.mxu0 %v267_v45  ;;  %1183 = vmatprep.subr.mxu1 %v595_v37  ;;  %v276_v45 = vlaneseq  ;;  %v829_v36 = vld [vmem:[#allocation7 + $0x160] sm:$0xff] }
  0x8e   :  { %467 = vmatpush2.msra.mxu0 %v266_v46  ;;  %1184 = vmatpush3.msra.mxu1 %v579_v38  ;;  %v821_v37 = vld [vmem:[#allocation7 + $0x120] sm:$0xff]  ;;  %v823_v38 = vld [vmem:[#allocation7 + $0x130] sm:$0xff] }
  0x8f   :  { %468 = vmatprep.subr.mxu0 %v265_v47  ;;  %1185 = vmatprep.subr.mxu1 %v594_v39  ;;  %v277_v46 = vshrl.u32 %v276_v45, 7  ;;  %v820_v39 = vld [vmem:[#allocation7 + $0x118] sm:$0xff]  ;;  %v807_v45 = vld [vmem:[#allocation7 + $0xb0] sm:$0xff] }
  0x90   :  { %469 = vmatpush2.msra.mxu0 %v264_v48  ;;  %1186 = vmatpush3.msra.mxu1 %v578_v40  ;;  %v274_v48 = vld [vmem:[%s1563_s2] sm:$0x3]  ;;  %v822_v40 = vld [vmem:[#allocation7 + $0x128] sm:$0xff] }
  0x91   :  { %470 = vmatprep.subr.mxu0 %v263_v49  ;;  %1187 = vmatprep.subr.mxu1 %v593_v41  ;;  %v278_v47 = vsub.s32 0, %v277_v46  ;;  %v282_v49 = vsub.s32 1, %v277_v46  ;;  %v814_v41 = vld [vmem:[#allocation7 + $0xe8] sm:$0xff]  ;;  %v809_v46 = vld [vmem:[#allocation7 + $0xc0] sm:$0xff] }
  0x92   :  { %471 = vmatpush2.msra.mxu0 %v262_v50  ;;  %1188 = vmatpush3.msra.mxu1 %v577_v42  ;;  %v816_v42 = vld [vmem:[#allocation7 + $0xf8] sm:$0xff] }
  0x93   :  { %472 = vmatprep.subr.mxu0 %v261_v51  ;;  %1189 = vmatprep.subr.mxu1 %v592_v43  ;;  %v279_v51 = vrot.slane %v274_v48, %v278_v47  ;;  %v813_v43 = vld [vmem:[#allocation7 + $0xe0] sm:$0xff]  ;;  %v806_v47 = vld [vmem:[#allocation7 + $0xa8] sm:$0xff] }
  0x94   :  { %473 = vmatpush2.msra.mxu0 %v260_v52  ;;  %1190 = vmatpush3.msra.mxu1 %v576_v44  ;;  %v283_v52 = vrot.slane %v274_v48, %v282_v49  ;;  %v815_v44 = vld [vmem:[#allocation7 + $0xf0] sm:$0xff]  ;;  %v808_v48 = vld [vmem:[#allocation7 + $0xb8] sm:$0xff] }
  0x95   :  { %474 = vmatprep.subr.mxu0 %v259_v53  ;;  %1220 = vmatprep.subr.mxu1 %v1385_v22  ;;  %v800_v49 = vld [vmem:[#allocation7 + $0x78] sm:$0xff] }
  0x96   :  { %475 = vmatpush2.msra.mxu0 %v258_v54 }
  0x97   :  { %476 = vmatprep.subr.mxu0 %v257_v55 }
  0x98   :  { %477 = vmatpush2.msra.mxu0 %v256_v56 }
  0x99   :  { %478 = vmatprep.subr.mxu0 %v255_v57 }
  0x9a   :  { %479 = vmatpush2.msra.mxu0 %v254_v58 }
  0x9b   :  { %480 = vmatprep.subr.mxu0 %v253_v59 }
  0x9c   :  { %481 = vmatpush2.msra.mxu0 %v252_v60 }
  0x9d   :  { %482 = vmatprep.subr.mxu0 %v251_v61 }
  0x9e   :  { %483 = vmatpush2.msra.mxu0 %v250_v62 }
  0x9f   :  { %484 = vmatprep.subr.mxu0 %v249_v63 }
  0xa0   :  { %485 = vmatpush2.msra.mxu0 %v248_v0 }
  0xa1   :  { %486 = vmatprep.subr.mxu0 %v247_v1 }
  0xa2   :  { %487 = vmatpush2.msra.mxu0 %v246_v2 }
  0xa3   :  { %488 = vmatprep.subr.mxu0 %v245_v3 }
  0xa4   :  { %489 = vmatpush2.msra.mxu0 %v244_v4 }
  0xa5   :  { %490 = vmatprep.subr.mxu0 %v243_v5 }
  0xa6   :  { %491 = vmatpush2.msra.mxu0 %v242_v6  ;;  %v701_v6 = vld [vmem:[%s1566_s5 + $0x78] sm:$0xff] }
  0xa7   :  { %492 = vmatprep.subr.mxu0 %v241_v7  ;;  %v700_v7 = vld [vmem:[%s1566_s5 + $0x70] sm:$0xff] }
  0xa8   :  { %493 = vmatpush2.msra.mxu0 %v240_v8  ;;  %v699_v8 = vld [vmem:[%s1566_s5 + $0x68] sm:$0xff] }
  0xa9   :  { %494 = vmatprep.subr.mxu0 %v239_v9  ;;  %v698_v9 = vld [vmem:[%s1566_s5 + $0x60] sm:$0xff] }
  0xaa   :  { %495 = vmatpush2.msra.mxu0 %v238_v10  ;;  %v697_v10 = vld [vmem:[%s1566_s5 + $0x58] sm:$0xff] }
  0xab   :  { %497 = vmatmul.mubr.f32.vlgmr.msra.gmra.mxu0 %v75_v11  ;;  %v696_v11 = vld [vmem:[%s1566_s5 + $0x50] sm:$0xff]  ;;  %861 = vmatprep.subr.mxu0 %v835_v29 }
  0xac   :  { %909 = vmatprep.mubr.f32.mxu0 %v1385_v22  ;;  %862 = vmatpush1.msra.mxu0 %v834_v31  ;;  %v791_v29 = vld [vmem:[#allocation7 + $0x30] sm:$0xff] }
  0xad   :  { %863 = vmatprep.subr.mxu0 %v828_v33 }
  0xae   :  { %864 = vmatpush1.msra.mxu0 %v827_v35 }
  0xaf   :  { %865 = vmatprep.subr.mxu0 %v821_v37 }
  0xb0   :  { %866 = vmatpush1.msra.mxu0 %v820_v39 }
  0xb1   :  { %867 = vmatprep.subr.mxu0 %v814_v41 }
  0xb2   :  { %868 = vmatpush1.msra.mxu0 %v813_v43 }
  0xb3   :  { %869 = vmatprep.subr.mxu0 %v807_v45 }
  0xb4   :  { %870 = vmatpush1.msra.mxu0 %v806_v47 }
  0xb5   :  { %871 = vmatprep.subr.mxu0 %v800_v49 }
 0x12a   :  { %v356_v50 = vpop.f32.mrf.mxu0 }
 0x12b   :  { %v357_v55 = vadd.f32 %v356_v50, %v279_v51  ;;  %v802_v50 = vld [vmem:[#allocation7 + $0x88] sm:$0xff]  ;;  %v799_v51 = vld [vmem:[#allocation7 + $0x70] sm:$0xff] }
 0x12c   :  { %v358_v53 = vpop.f32.mrf.mxu0  ;;  %872 = vmatpush1.msra.mxu0 %v799_v51 }
 0x12d   :  { %v427_v54 = vpop.f32.mrf.mxu1  ;;  %v359_v56 = vadd.f32 %v358_v53, %v283_v52  ;;  %v801_v52 = vld [vmem:[#allocation7 + $0x80] sm:$0xff] }
 0x12e   :  { %v428_v58 = vadd.f32 %v427_v54, %v357_v55  ;;  %v793_v53 = vld [vmem:[#allocation7 + $0x40] sm:$0xff]  ;;  %v795_v54 = vld [vmem:[#allocation7 + $0x50] sm:$0xff]  ;;  %v792_v55 = vld [vmem:[#allocation7 + $0x38] sm:$0xff] }
 0x12f   :  { %v429_v57 = vpop.f32.mrf.mxu1  ;;  %873 = vmatprep.subr.mxu0 %v793_v53 }
 0x130   :  { %v430_v61 = vadd.f32 %v429_v57, %v359_v56  ;;  %v794_v56 = vld [vmem:[#allocation7 + $0x48] sm:$0xff]  ;;  %874 = vmatpush1.msra.mxu0 %v792_v55 }
 0x131   :  { %v786_v57 = vld [vmem:[#allocation7 + $0x8] sm:$0xff] }
 0x132   :  { %875 = vmatprep.subr.mxu0 %v786_v57 }
 0x134   :  { %v569_v60 = vpop.f32.mrf.mxu1 }
 0x136   :  { %v571_v2 = vpop.f32.mrf.mxu1 }
 0x16b   :  { %v498_v59 = vpop.f32.mrf.mxu0 }
 0x16c   :  { %v499_v62 = vadd.f32 %v498_v59, %v428_v58  ;;  %v788_v58 = vld [vmem:[#allocation7 + $0x18] sm:$0xff]  ;;  %v785_v59 = vld [vmem:[#allocation7] sm:$0xff] }
 0x16d   :  { %v500_v63 = vpop.f32.mrf.mxu0  ;;  %876 = vmatpush1.msra.mxu0 %v785_v59 }
 0x16e   :  { %v501_v0 = vadd.f32 %v500_v63, %v430_v61  ;;  %v570_v1 = vadd.f32 %v569_v60, %v499_v62  ;;  %v787_v60 = vld [vmem:[#allocation7 + $0x10] sm:$0xff]  ;;  %v1153_v62 = vld [vmem:[%s1567_s6] ss:$0 sm:$0xff]  ;;  %s1387_s6 = smov [#allocation8]  }
 0x16f   :  { %v839_v61 = vld [vmem:[#allocation7 + $0x1b0] sm:$0xff]  ;;  %s1141_s21 = sshll.u32 %s1387_s6, 4  ;;  %s1142_s21 = int_to_ptr.vmem [resolvable:$true] %s1141_s21 }
 0x170   :  { %v572_v3 = vadd.f32 %v571_v2, %v501_v0  ;;  %v574_v5 = vmax.f32 %v570_v1, 0.0  ;;  %1003 = vmatprep.subr.mxu0 %v839_v61  ;;  %s1350_s22 = scalar_lea.vmem %s1142_s21, 896  ;;  %p1355_p2 = scmp.lt.s32.totalorder %s1142_s21, %s1142_s21 }
 0x171   :  { %p1351_p1 = scmp.ne.s32.totalorder %s1142_s21, %s1350_s22  ;;  %p1356_p3 = scmp.lt.s32.totalorder %s1350_s22, %s1350_s22 }
 0x172   :  { %v575_v4 = vmax.f32 %v572_v3, 0.0 }
 0x173   :  { %p1357_p4 = por %p1356_p3, %p1355_p2 }
 0x174   :  { %679 = vmatprep.mubr.f32.mxu1 %v575_v4 }
 0x175   :  { %680 = vmatmul.mubr.f32.vlgmr.msra.gmra.mxu1 %v574_v5  ;;  %v838_v5 = vld [vmem:[#allocation7 + $0x1a8] sm:$0xff]  ;;  %p1358_p5 = pnand %p1357_p4, %p1351_p1 }
 0x176   :  { %1221 = vmatpush3.msra.mxu1 %v701_v6  ;;  %1252 = vmatprep.mubr.msk.f32.mxu1 %vm1386_vm1, %v1385_v22  ;;  %v840_v6 = vld [vmem:[#allocation7 + $0x1b8] sm:$0xff] }
 0x177   :  { %1222 = vmatprep.subr.mxu1 %v1385_v22 }
 0x178   :  { %1223 = vmatpush3.msra.mxu1 %v700_v7 }
 0x179   :  { %1224 = vmatprep.subr.mxu1 %v1385_v22 }
 0x17a   :  { %1225 = vmatpush3.msra.mxu1 %v699_v8  ;;  %v832_v8 = vld [vmem:[#allocation7 + $0x178] sm:$0xff] }
 0x17b   :  { %1226 = vmatprep.subr.mxu1 %v1385_v22 }
 0x17c   :  { %1227 = vmatpush3.msra.mxu1 %v698_v9  ;;  %v831_v9 = vld [vmem:[#allocation7 + $0x170] sm:$0xff] }
 0x17d   :  { %1228 = vmatprep.subr.mxu1 %v1385_v22 }
 0x17e   :  { %1229 = vmatpush3.msra.mxu1 %v697_v10  ;;  %v833_v10 = vld [vmem:[#allocation7 + $0x180] sm:$0xff] }
 0x17f   :  { %1230 = vmatprep.subr.mxu1 %v1385_v22 }
 0x180   :  { %1231 = vmatpush3.msra.mxu1 %v696_v11  ;;  %v825_v11 = vld [vmem:[#allocation7 + $0x140] sm:$0xff] }
 0x181   :  { %1232 = vmatprep.subr.mxu1 %v1385_v22 }
 0x182   :  { %1233 = vmatpush3.msra.mxu1 %v695_v12  ;;  %v824_v12 = vld [vmem:[#allocation7 + $0x138] sm:$0xff] }
 0x183   :  { %1234 = vmatprep.subr.mxu1 %v1385_v22 }
 0x184   :  { %1235 = vmatpush3.msra.mxu1 %v694_v13  ;;  %v826_v13 = vld [vmem:[#allocation7 + $0x148] sm:$0xff] }
 0x185   :  { %1236 = vmatprep.subr.mxu1 %v1385_v22 }
 0x186   :  { %1237 = vmatpush3.msra.mxu1 %v693_v14  ;;  %v818_v14 = vld [vmem:[#allocation7 + $0x108] sm:$0xff] }
 0x187   :  { %1238 = vmatprep.subr.mxu1 %v1385_v22 }
 0x188   :  { %1239 = vmatpush3.msra.mxu1 %v692_v15  ;;  %v817_v15 = vld [vmem:[#allocation7 + $0x100] sm:$0xff] }
 0x189   :  { %1240 = vmatprep.subr.mxu1 %v1385_v22 }
 0x18a   :  { %1241 = vmatpush3.msra.mxu1 %v691_v16  ;;  %v819_v16 = vld [vmem:[#allocation7 + $0x110] sm:$0xff] }
 0x18b   :  { %1242 = vmatprep.subr.mxu1 %v1385_v22 }
 0x18c   :  { %1243 = vmatpush3.msra.mxu1 %v690_v17  ;;  %v811_v17 = vld [vmem:[#allocation7 + $0xd0] sm:$0xff] }
 0x18d   :  { %1244 = vmatprep.subr.mxu1 %v1385_v22 }
 0x18e   :  { %1245 = vmatpush3.msra.mxu1 %v689_v18  ;;  %v810_v18 = vld [vmem:[#allocation7 + $0xc8] sm:$0xff] }
 0x18f   :  { %1246 = vmatprep.subr.mxu1 %v1385_v22 }
 0x190   :  { %1247 = vmatpush3.msra.mxu1 %v688_v19  ;;  %v812_v19 = vld [vmem:[#allocation7 + $0xd8] sm:$0xff] }
 0x191   :  { %1248 = vmatprep.subr.mxu1 %v1385_v22 }
 0x192   :  { %1249 = vmatpush3.msra.mxu1 %v687_v20  ;;  %v804_v20 = vld [vmem:[#allocation7 + $0x98] sm:$0xff] }
 0x193   :  { %1250 = vmatprep.subr.mxu1 %v1385_v22 }
 0x194   :  { %1251 = vmatpush3.msra.mxu1 %v686_v21  ;;  %v803_v21 = vld [vmem:[#allocation7 + $0x90] sm:$0xff] }
 0x195   :  { %932 = vmatprep.subr.mxu1 %v837_v30 }
 0x235   :  { %v1191_v23 = vpop.f32.mrf.mxu1 }
 0x237   :  { %v1192_v25 = vpop.f32.mrf.mxu1 }
 0x238   :  { %v1193_v26 = vadd.f32 %v1192_v25, %v1191_v23  ;;  %v805_v23 = vld [vmem:[#allocation7 + $0xa0] sm:$0xff]  ;;  %v796_v25 = vld [vmem:[#allocation7 + $0x58] sm:$0xff] }
 0x23a   :  { %v682_v27 = vadd.f32 %v1193_v26, %v1152_v24  ;;  %v797_v24 = vld [vmem:[#allocation7 + $0x60] sm:$0xff]  ;;  %v798_v26 = vld [vmem:[#allocation7 + $0x68] sm:$0xff] }
 0x23c   :  { %v685_v28 = vmax.f32 %v682_v27, 0.0  ;;  %v790_v27 = vld [vmem:[#allocation7 + $0x28] sm:$0xff] }
 0x23e   :  { %1253 = vmatmul.mubr.f32.vlgmr.msra.gmra.mxu1 %v685_v28  ;;  %v789_v28 = vld [vmem:[#allocation7 + $0x20] sm:$0xff] }
 0x23f   :  { %980 = vmatprep.mubr.f32.mxu1 %v1385_v22  ;;  %933 = vmatpush1.msra.mxu1 %v836_v32 }
 0x240   :  { %934 = vmatprep.subr.mxu1 %v830_v34 }
 0x241   :  { %935 = vmatpush1.msra.mxu1 %v829_v36 }
 0x242   :  { %936 = vmatprep.subr.mxu1 %v823_v38 }
 0x243   :  { %937 = vmatpush1.msra.mxu1 %v822_v40 }
 0x244   :  { %938 = vmatprep.subr.mxu1 %v816_v42 }
 0x245   :  { %939 = vmatpush1.msra.mxu1 %v815_v44 }
 0x246   :  { %940 = vmatprep.subr.mxu1 %v809_v46 }
 0x247   :  { %941 = vmatpush1.msra.mxu1 %v808_v48 }
 0x248   :  { %942 = vmatprep.subr.mxu1 %v802_v50 }
 0x249   :  { %943 = vmatpush1.msra.mxu1 %v801_v52 }
 0x24a   :  { %944 = vmatprep.subr.mxu1 %v795_v54 }
 0x24b   :  { %945 = vmatpush1.msra.mxu1 %v794_v56 }
 0x24c   :  { %946 = vmatprep.subr.mxu1 %v788_v58 }
 0x24d   :  { %947 = vmatpush1.msra.mxu1 %v787_v60 }
 0x24e   :  { %1255 = vmatprep.subr.mxu1 %v1385_v22 }
 0x2fe   :  { %v775_v63 = vpop.f32.mrf.mxu1 }
 0x2ff   :  { %v776_v0 = vadd.f32 %v1153_v62, %v775_v63 }
 0x300   :  { %v1254_v1 = vpop.f32.mrf.mxu1 }
 0x301   :  { %v1154_v2 = vmul.f32 -1.442695, %v776_v0 }
 0x303   :  { %1286 = vpow2.f32 %v1154_v2 }
 0x310   :  { %v1287_v3 = vpop.eup %1286 }
 0x311   :  { %v782_v4 = vadd.f32 1.0, %v1287_v3 }
 0x313   :  { %1288 = vrcp.f32 %v782_v4 }
 0x320   :  { %v1289_v7 = vpop.eup %1288 }
 0x321   :  { %1155 = vmatmul.mubr.msk.f32.vlgmr.msra.gmra.mxu0 %vm841_vm2, %v1289_v7  ;;  %1156 = vmatmul.mubr.msk.f32.vlgmr.msra.gmra.mxu1 %vm841_vm2, %v1289_v7 }
 0x322   :  { %1004 = vmatpush1.msra.mxu0 %v838_v5  ;;  %1256 = vmatpush3.msra.mxu1 %v840_v6 }
 0x323   :  { %1005 = vmatprep.subr.mxu0 %v832_v8  ;;  %1257 = vmatprep.subr.mxu1 %v1385_v22 }
 0x324   :  { %1006 = vmatpush1.msra.mxu0 %v831_v9  ;;  %1258 = vmatpush3.msra.mxu1 %v833_v10 }
 0x325   :  { %1007 = vmatprep.subr.mxu0 %v825_v11  ;;  %1259 = vmatprep.subr.mxu1 %v1385_v22 }
 0x326   :  { %1008 = vmatpush1.msra.mxu0 %v824_v12  ;;  %1260 = vmatpush3.msra.mxu1 %v826_v13 }
 0x327   :  { %1009 = vmatprep.subr.mxu0 %v818_v14  ;;  %1261 = vmatprep.subr.mxu1 %v1385_v22 }
 0x328   :  { %1010 = vmatpush1.msra.mxu0 %v817_v15  ;;  %1262 = vmatpush3.msra.mxu1 %v819_v16 }
 0x329   :  { %1011 = vmatprep.subr.mxu0 %v811_v17  ;;  %1263 = vmatprep.subr.mxu1 %v1385_v22 }
 0x32a   :  { %1012 = vmatpush1.msra.mxu0 %v810_v18  ;;  %1264 = vmatpush3.msra.mxu1 %v812_v19 }
 0x32b   :  { %1013 = vmatprep.subr.mxu0 %v804_v20  ;;  %1265 = vmatprep.subr.mxu1 %v1385_v22 }
 0x32c   :  { %1014 = vmatpush1.msra.mxu0 %v803_v21  ;;  %1266 = vmatpush3.msra.mxu1 %v805_v23 }
 0x32d   :  { %1015 = vmatprep.subr.mxu0 %v797_v24  ;;  %1267 = vmatprep.subr.mxu1 %v1385_v22 }
 0x32e   :  { %1016 = vmatpush1.msra.mxu0 %v796_v25  ;;  %1268 = vmatpush3.msra.mxu1 %v798_v26 }
 0x32f   :  { %1017 = vmatprep.subr.mxu0 %v790_v27  ;;  %1269 = vmatprep.subr.mxu1 %v1385_v22 }
 0x330   :  { %1018 = vmatpush1.msra.mxu0 %v789_v28  ;;  %1051 = vmatprep.mubr.f32.mxu0 %v1385_v22 }
 0x331   :  { %1270 = vmatpush3.msra.mxu1 %v791_v29  ;;  %1271 = vmatprep.mubr.msk.f32.mxu1 %vm1386_vm1, %v1385_v22 }
 0x332   :  { %1157 = vmatmul.mubr.msk.f32.vlgmr.msra.gmra.mxu0 %vm841_vm2, %v1289_v7  ;;  %1272 = vmatmul.mubr.msk.f32.vlgmr.msra.gmra.mxu1 %vm841_vm2, %v1289_v7 }
 0x3e1   :  { %v911_v30 = vpop.f32.mrf.mxu0  ;;  %v982_v31 = vpop.f32.mrf.mxu1 }
 0x3e2   :  { %1128 = vst [vmem:[#allocation8] sm:$0xff] %v911_v30  ;;  %1130 = vst [vmem:[#allocation8 + $0x10] sm:$0xff] %v982_v31 }
 0x3e3   :  { %v913_v32 = vpop.f32.mrf.mxu0  ;;  %v984_v33 = vpop.f32.mrf.mxu1 }
 0x3e4   :  { %1129 = vst [vmem:[#allocation8 + $0x8] sm:$0xff] %v913_v32  ;;  %1131 = vst [vmem:[#allocation8 + $0x18] sm:$0xff] %v984_v33 }
 0x3f2   :  { %v1053_v34 = vpop.f32.mrf.mxu0  ;;  %v1124_v35 = vpop.f32.mrf.mxu1 }
 0x3f3   :  { %1132 = vst [vmem:[#allocation8 + $0x20] sm:$0xff] %v1053_v34  ;;  %1134 = vst.msk [vmem:[#allocation8 + $0x30] sm:$0xff] %vm286_vm0, %v1124_v35 }
 0x3f4   :  { %v1055_v22 = vpop.f32.mrf.mxu0  ;;  %v1273_v36 = vpop.f32.mrf.mxu1 }
 0x3f5   :  { %1133 = vst [vmem:[#allocation8 + $0x28] sm:$0xff] %v1055_v22 }
 0x3f6   :  { %1361 = shalt.err (!%p1358_p5)
}
 0x3f7   :  { %1144 = dma.vmem_to_hbm [thread:$0]  %s1142_s21, 896, %s1569_s8, [#allocation4]  }
 0x3f8   :  { %1374 = dma.done.wait [#allocation4], 896  }
 0x3f9   :  { %1375 = vsyncadd [#allocation4], 4294966400 }
 0x3fa   :  { %1148 = vsyncpa [#allocation3], 1 }
 0x3fb   :  { %1149 = vsyncpa [#allocation6], 1 }
 0x3fc   :  { %1150 = vsyncpa [#allocation4], 1 }

// kernel: tpu_custom_call.1
= control target key start
LH: loop header
LB: loop body
LE: loop exit
PB: predicated region body
PF: predicated region fallthrough
CT: control target
= control target key end

     0   :  { %13 = vsyncpa [#allocation3], 0  ;;  %s1561_s0 = inlined_call_operand.vmem [shape: f32[8,784], index: 0, kind: input, shape index: {}]   ;;  %s1562_s1 = inlined_call_operand.hbm [shape: f32[784,256], index: 1, kind: input, shape index: {}]   ;;  %s1563_s2 = inlined_call_operand.vmem [shape: f32[1,256], index: 2, kind: input, shape index: {}]   ;;  %s1564_s3 = inlined_call_operand.hbm [shape: f32[256,128], index: 3, kind: input, shape index: {}]   ;;  %s1565_s4 = inlined_call_operand.vmem [shape: f32[1,128], index: 4, kind: input, shape index: {}]   ;;  %s1566_s5 = inlined_call_operand.vmem [shape: f32[128,64], index: 5, kind: input, shape index: {}]   ;;  %s1567_s6 = inlined_call_operand.vmem [shape: f32[1,64], index: 6, kind: input, shape index: {}]   ;;  %s1568_s7 = inlined_call_operand.hbm [shape: f32[64,784], index: 7, kind: input, shape index: {}]   ;;  %s1569_s8 = inlined_call_operand.hbm [shape: f32[8,784], index: 8, kind: output, shape index: {}]  }
   0x1   :  { %14 = vsyncpa [#allocation6], 0 }
   0x2   :  { %15 = vsyncpa [#allocation4], 0  ;;  %s1376_s27 = smov [#allocation5]  }
   0x3   :  { %s37_s28 = sshll.u32 %s1376_s27, 4  ;;  %s38_s28 = int_to_ptr.vmem [resolvable:$true] %s37_s28 }
   0x4   :  { %s1298_s29 = scalar_lea.vmem %s38_s28, 4096  ;;  %p1303_p1 = scmp.lt.s32.totalorder %s38_s28, %s38_s28 }
   0x5   :  { %p1299_p0 = scmp.ne.s32.totalorder %s38_s28, %s1298_s29  ;;  %p1304_p2 = scmp.lt.s32.totalorder %s1298_s29, %s1298_s29 }
   0x7   :  { %p1305_p3 = por %p1304_p2, %p1303_p1 }
   0x9   :  { %p1306_p4 = pnand %p1305_p3, %p1299_p0 }
   0xb   :  { %1309 = shalt.err (!%p1306_p4)
}
   0xc   :  { %s1377_s30 = smov 128   ;;  %s1378_s9 = smov 8  }
   0xd   :  { %43 = dma.hbm_to_vmem [thread:$0]  %s1564_s3, 4096, %s38_s28, [#allocation6], %s1377_s30, %s1377_s30, %s1378_s9  }
   0xe   :  { %s1379_s12 = smov [#allocation2]  }
   0xf   :  { %s23_s13 = sshll.u32 %s1379_s12, 4  ;;  %s24_s13 = int_to_ptr.vmem [resolvable:$true] %s23_s13 }
  0x10   :  { %s1318_s14 = scalar_lea.vmem %s24_s13, 25088  ;;  %p1323_p6 = scmp.lt.s32.totalorder %s24_s13, %s24_s13 }
  0x11   :  { %p1319_p5 = scmp.ne.s32.totalorder %s24_s13, %s1318_s14  ;;  %p1324_p7 = scmp.lt.s32.totalorder %s1318_s14, %s1318_s14 }
  0x13   :  { %p1325_p8 = por %p1324_p7, %p1323_p6 }
  0x15   :  { %p1326_p9 = pnand %p1325_p8, %p1319_p5 }
  0x17   :  { %1329 = shalt.err (!%p1326_p9)
}
  0x18   :  { %s1380_s15 = smov 256   ;;  %s1381_s16 = smov 16  }
  0x19   :  { %29 = dma.hbm_to_vmem [thread:$0]  %s1562_s1, 25088, %s24_s13, [#allocation3], %s1380_s15, %s1380_s15, %s1381_s16  }
  0x1a   :  { %s1382_s19 = smov [#allocation7]  }
  0x1b   :  { %s55_s20 = sshll.u32 %s1382_s19, 4  ;;  %s56_s20 = int_to_ptr.vmem [resolvable:$true] %s55_s20 }
  0x1c   :  { %s1338_s3 = scalar_lea.vmem %s56_s20, 7168  ;;  %p1343_p11 = scmp.lt.s32.totalorder %s56_s20, %s56_s20 }
  0x1d   :  { %p1339_p10 = scmp.ne.s32.totalorder %s56_s20, %s1338_s3  ;;  %p1344_p12 = scmp.lt.s32.totalorder %s1338_s3, %s1338_s3 }
  0x1f   :  { %p1345_p13 = por %p1344_p12, %p1343_p11 }
  0x21   :  { %p1346_p0 = pnand %p1345_p13, %p1339_p10 }
  0x23   :  { %1349 = shalt.err (!%p1346_p0)
}
  0x24   :  { %s1383_s21 = smov 896   ;;  %s1384_s22 = smov 56  }
  0x25   :  { %61 = dma.hbm_to_vmem [thread:$0]  %s1568_s7, 7168, %s56_s20, [#allocation6], %s1383_s21, %s1383_s21, %s1384_s22  }
  0x26   :  { %1370 = dma.done.wait [#allocation3], 25088  }
  0x27   :  { %1371 = vsyncadd [#allocation3], 4294942208 }
  0x28   :  { %1372 = dma.done.wait [#allocation6], 11264  }
  0x29   :  { %1373 = vsyncadd [#allocation6], 4294956032  ;;  %v109_v0 = vld [vmem:[#allocation2 + $0xf8] sm:$0xff]  ;;  %v108_v1 = vld [vmem:[#allocation2 + $0xf0] sm:$0xff]  ;;  %vm286_vm0 = vcmask 130048   ;;  %vm1386_vm1 = vmmov 0  }
  0x2a   :  { %v107_v2 = vld [vmem:[#allocation2 + $0xe8] sm:$0xff]  ;;  %290 = vmatprep.subr.mxu0 %v109_v0  ;;  %v173_v3 = vld [vmem:[#allocation2 + $0x2f8] sm:$0xff]  ;;  %v106_v4 = vld [vmem:[#allocation2 + $0xe0] sm:$0xff]  ;;  %vm841_vm2 = vcmask 523264  }
  0x2b   :  { %v172_v5 = vld [vmem:[#allocation2 + $0x2f0] sm:$0xff]  ;;  %291 = vmatpush1.msra.mxu0 %v108_v1  ;;  %361 = vmatprep.subr.mxu1 %v173_v3  ;;  %v105_v6 = vld [vmem:[#allocation2 + $0xd8] sm:$0xff]  ;;  %v171_v7 = vld [vmem:[#allocation2 + $0x2e8] sm:$0xff] }
  0x2c   :  { %292 = vmatprep.subr.mxu0 %v107_v2  ;;  %362 = vmatpush1.msra.mxu1 %v172_v5  ;;  %v104_v8 = vld [vmem:[#allocation2 + $0xd0] sm:$0xff]  ;;  %v170_v9 = vld [vmem:[#allocation2 + $0x2e0] sm:$0xff]  ;;  %v169_v10 = vld [vmem:[#allocation2 + $0x2d8] sm:$0xff] }
  0x2d   :  { %293 = vmatpush1.msra.mxu0 %v106_v4  ;;  %363 = vmatprep.subr.mxu1 %v171_v7  ;;  %v103_v11 = vld [vmem:[#allocation2 + $0xc8] sm:$0xff]  ;;  %v168_v12 = vld [vmem:[#allocation2 + $0x2d0] sm:$0xff]  ;;  %v102_v13 = vld [vmem:[#allocation2 + $0xc0] sm:$0xff] }
  0x2e   :  { %294 = vmatprep.subr.mxu0 %v105_v6  ;;  %364 = vmatpush1.msra.mxu1 %v170_v9  ;;  %v167_v14 = vld [vmem:[#allocation2 + $0x2c8] sm:$0xff]  ;;  %v101_v15 = vld [vmem:[#allocation2 + $0xb8] sm:$0xff]  ;;  %v166_v16 = vld [vmem:[#allocation2 + $0x2c0] sm:$0xff] }
  0x2f   :  { %295 = vmatpush1.msra.mxu0 %v104_v8  ;;  %365 = vmatprep.subr.mxu1 %v169_v10  ;;  %v100_v17 = vld [vmem:[#allocation2 + $0xb0] sm:$0xff]  ;;  %v165_v18 = vld [vmem:[#allocation2 + $0x2b8] sm:$0xff]  ;;  %v99_v19 = vld [vmem:[#allocation2 + $0xa8] sm:$0xff] }
  0x30   :  { %296 = vmatprep.subr.mxu0 %v103_v11  ;;  %366 = vmatpush1.msra.mxu1 %v168_v12  ;;  %v164_v20 = vld [vmem:[#allocation2 + $0x2b0] sm:$0xff]  ;;  %v98_v21 = vld [vmem:[#allocation2 + $0xa0] sm:$0xff]  ;;  %v163_v22 = vld [vmem:[#allocation2 + $0x2a8] sm:$0xff] }
  0x31   :  { %297 = vmatpush1.msra.mxu0 %v102_v13  ;;  %367 = vmatprep.subr.mxu1 %v167_v14  ;;  %v97_v23 = vld [vmem:[#allocation2 + $0x98] sm:$0xff]  ;;  %v162_v24 = vld [vmem:[#allocation2 + $0x2a0] sm:$0xff]  ;;  %v96_v25 = vld [vmem:[#allocation2 + $0x90] sm:$0xff] }
  0x32   :  { %298 = vmatprep.subr.mxu0 %v101_v15  ;;  %368 = vmatpush1.msra.mxu1 %v166_v16  ;;  %v161_v26 = vld [vmem:[#allocation2 + $0x298] sm:$0xff]  ;;  %v95_v27 = vld [vmem:[#allocation2 + $0x88] sm:$0xff]  ;;  %v160_v28 = vld [vmem:[#allocation2 + $0x290] sm:$0xff] }
  0x33   :  { %299 = vmatpush1.msra.mxu0 %v100_v17  ;;  %369 = vmatprep.subr.mxu1 %v165_v18  ;;  %v94_v29 = vld [vmem:[#allocation2 + $0x80] sm:$0xff]  ;;  %v159_v30 = vld [vmem:[#allocation2 + $0x288] sm:$0xff]  ;;  %v93_v31 = vld [vmem:[#allocation2 + $0x78] sm:$0xff] }
  0x34   :  { %300 = vmatprep.subr.mxu0 %v99_v19  ;;  %370 = vmatpush1.msra.mxu1 %v164_v20  ;;  %v158_v32 = vld [vmem:[#allocation2 + $0x280] sm:$0xff]  ;;  %v92_v33 = vld [vmem:[#allocation2 + $0x70] sm:$0xff]  ;;  %v157_v34 = vld [vmem:[#allocation2 + $0x278] sm:$0xff] }
  0x35   :  { %301 = vmatpush1.msra.mxu0 %v98_v21  ;;  %371 = vmatprep.subr.mxu1 %v163_v22  ;;  %v91_v35 = vld [vmem:[#allocation2 + $0x68] sm:$0xff]  ;;  %v156_v36 = vld [vmem:[#allocation2 + $0x270] sm:$0xff]  ;;  %v90_v37 = vld [vmem:[#allocation2 + $0x60] sm:$0xff] }
  0x36   :  { %302 = vmatprep.subr.mxu0 %v97_v23  ;;  %372 = vmatpush1.msra.mxu1 %v162_v24  ;;  %v155_v38 = vld [vmem:[#allocation2 + $0x268] sm:$0xff]  ;;  %v89_v39 = vld [vmem:[#allocation2 + $0x58] sm:$0xff]  ;;  %v154_v40 = vld [vmem:[#allocation2 + $0x260] sm:$0xff] }
  0x37   :  { %303 = vmatpush1.msra.mxu0 %v96_v25  ;;  %373 = vmatprep.subr.mxu1 %v161_v26  ;;  %v88_v41 = vld [vmem:[#allocation2 + $0x50] sm:$0xff]  ;;  %v153_v42 = vld [vmem:[#allocation2 + $0x258] sm:$0xff]  ;;  %v87_v43 = vld [vmem:[#allocation2 + $0x48] sm:$0xff] }
  0x38   :  { %304 = vmatprep.subr.mxu0 %v95_v27  ;;  %374 = vmatpush1.msra.mxu1 %v160_v28  ;;  %v152_v44 = vld [vmem:[#allocation2 + $0x250] sm:$0xff]  ;;  %v86_v45 = vld [vmem:[#allocation2 + $0x40] sm:$0xff]  ;;  %v151_v46 = vld [vmem:[#allocation2 + $0x248] sm:$0xff] }
  0x39   :  { %305 = vmatpush1.msra.mxu0 %v94_v29  ;;  %375 = vmatprep.subr.mxu1 %v159_v30  ;;  %v85_v47 = vld [vmem:[#allocation2 + $0x38] sm:$0xff]  ;;  %v150_v48 = vld [vmem:[#allocation2 + $0x240] sm:$0xff]  ;;  %v84_v49 = vld [vmem:[#allocation2 + $0x30] sm:$0xff] }
  0x3a   :  { %306 = vmatprep.subr.mxu0 %v93_v31  ;;  %376 = vmatpush1.msra.mxu1 %v158_v32  ;;  %v149_v50 = vld [vmem:[#allocation2 + $0x238] sm:$0xff]  ;;  %v83_v51 = vld [vmem:[#allocation2 + $0x28] sm:$0xff]  ;;  %v148_v52 = vld [vmem:[#allocation2 + $0x230] sm:$0xff] }
  0x3b   :  { %307 = vmatpush1.msra.mxu0 %v92_v33  ;;  %377 = vmatprep.subr.mxu1 %v157_v34  ;;  %v82_v53 = vld [vmem:[#allocation2 + $0x20] sm:$0xff]  ;;  %v147_v54 = vld [vmem:[#allocation2 + $0x228] sm:$0xff]  ;;  %v81_v55 = vld [vmem:[#allocation2 + $0x18] sm:$0xff] }
  0x3c   :  { %308 = vmatprep.subr.mxu0 %v91_v35  ;;  %378 = vmatpush1.msra.mxu1 %v156_v36  ;;  %v146_v56 = vld [vmem:[#allocation2 + $0x220] sm:$0xff]  ;;  %v80_v57 = vld [vmem:[#allocation2 + $0x10] sm:$0xff]  ;;  %v145_v58 = vld [vmem:[#allocation2 + $0x218] sm:$0xff] }
  0x3d   :  { %309 = vmatpush1.msra.mxu0 %v90_v37  ;;  %379 = vmatprep.subr.mxu1 %v155_v38  ;;  %v79_v59 = vld [vmem:[#allocation2 + $0x8] sm:$0xff]  ;;  %v144_v60 = vld [vmem:[#allocation2 + $0x210] sm:$0xff]  ;;  %v78_v61 = vld [vmem:[#allocation2] sm:$0xff] }
  0x3e   :  { %310 = vmatprep.subr.mxu0 %v89_v39  ;;  %380 = vmatpush1.msra.mxu1 %v154_v40  ;;  %v143_v62 = vld [vmem:[#allocation2 + $0x208] sm:$0xff]  ;;  %v141_v63 = vld [vmem:[#allocation2 + $0x1f8] sm:$0xff]  ;;  %v142_v0 = vld [vmem:[#allocation2 + $0x200] sm:$0xff] }
  0x3f   :  { %311 = vmatpush1.msra.mxu0 %v88_v41  ;;  %381 = vmatprep.subr.mxu1 %v153_v42  ;;  %v140_v1 = vld [vmem:[#allocation2 + $0x1f0] sm:$0xff]  ;;  %v205_v2 = vld [vmem:[#allocation2 + $0x3f8] sm:$0xff]  ;;  %v139_v3 = vld [vmem:[#allocation2 + $0x1e8] sm:$0xff] }
  0x40   :  { %312 = vmatprep.subr.mxu0 %v87_v43  ;;  %382 = vmatpush1.msra.mxu1 %v152_v44  ;;  %v204_v4 = vld [vmem:[#allocation2 + $0x3f0] sm:$0xff]  ;;  %v138_v5 = vld [vmem:[#allocation2 + $0x1e0] sm:$0xff]  ;;  %v203_v6 = vld [vmem:[#allocation2 + $0x3e8] sm:$0xff] }
  0x41   :  { %313 = vmatpush1.msra.mxu0 %v86_v45  ;;  %383 = vmatprep.subr.mxu1 %v151_v46  ;;  %v137_v7 = vld [vmem:[#allocation2 + $0x1d8] sm:$0xff]  ;;  %v202_v8 = vld [vmem:[#allocation2 + $0x3e0] sm:$0xff]  ;;  %v136_v9 = vld [vmem:[#allocation2 + $0x1d0] sm:$0xff] }
  0x42   :  { %314 = vmatprep.subr.mxu0 %v85_v47  ;;  %384 = vmatpush1.msra.mxu1 %v150_v48  ;;  %v201_v10 = vld [vmem:[#allocation2 + $0x3d8] sm:$0xff]  ;;  %v135_v11 = vld [vmem:[#allocation2 + $0x1c8] sm:$0xff]  ;;  %v200_v12 = vld [vmem:[#allocation2 + $0x3d0] sm:$0xff] }
  0x43   :  { %315 = vmatpush1.msra.mxu0 %v84_v49  ;;  %385 = vmatprep.subr.mxu1 %v149_v50  ;;  %v134_v13 = vld [vmem:[#allocation2 + $0x1c0] sm:$0xff]  ;;  %v199_v14 = vld [vmem:[#allocation2 + $0x3c8] sm:$0xff]  ;;  %v133_v15 = vld [vmem:[#allocation2 + $0x1b8] sm:$0xff] }
  0x44   :  { %316 = vmatprep.subr.mxu0 %v83_v51  ;;  %386 = vmatpush1.msra.mxu1 %v148_v52  ;;  %v198_v16 = vld [vmem:[#allocation2 + $0x3c0] sm:$0xff]  ;;  %v132_v17 = vld [vmem:[#allocation2 + $0x1b0] sm:$0xff]  ;;  %v197_v18 = vld [vmem:[#allocation2 + $0x3b8] sm:$0xff] }
  0x45   :  { %317 = vmatpush1.msra.mxu0 %v82_v53  ;;  %387 = vmatprep.subr.mxu1 %v147_v54  ;;  %v131_v19 = vld [vmem:[#allocation2 + $0x1a8] sm:$0xff]  ;;  %v196_v20 = vld [vmem:[#allocation2 + $0x3b0] sm:$0xff]  ;;  %v130_v21 = vld [vmem:[#allocation2 + $0x1a0] sm:$0xff] }
  0x46   :  { %318 = vmatprep.subr.mxu0 %v81_v55  ;;  %388 = vmatpush1.msra.mxu1 %v146_v56  ;;  %v195_v22 = vld [vmem:[#allocation2 + $0x3a8] sm:$0xff]  ;;  %v129_v23 = vld [vmem:[#allocation2 + $0x198] sm:$0xff]  ;;  %v194_v24 = vld [vmem:[#allocation2 + $0x3a0] sm:$0xff] }
  0x47   :  { %319 = vmatpush1.msra.mxu0 %v80_v57  ;;  %389 = vmatprep.subr.mxu1 %v145_v58  ;;  %v128_v25 = vld [vmem:[#allocation2 + $0x190] sm:$0xff]  ;;  %v193_v26 = vld [vmem:[#allocation2 + $0x398] sm:$0xff]  ;;  %v127_v27 = vld [vmem:[#allocation2 + $0x188] sm:$0xff] }
  0x48   :  { %320 = vmatprep.subr.mxu0 %v79_v59  ;;  %390 = vmatpush1.msra.mxu1 %v144_v60  ;;  %v192_v28 = vld [vmem:[#allocation2 + $0x390] sm:$0xff]  ;;  %v126_v29 = vld [vmem:[#allocation2 + $0x180] sm:$0xff]  ;;  %v191_v30 = vld [vmem:[#allocation2 + $0x388] sm:$0xff] }
  0x49   :  { %321 = vmatpush1.msra.mxu0 %v78_v61  ;;  %391 = vmatprep.subr.mxu1 %v143_v62  ;;  %v125_v31 = vld [vmem:[#allocation2 + $0x178] sm:$0xff]  ;;  %v190_v32 = vld [vmem:[#allocation2 + $0x380] sm:$0xff]  ;;  %v124_v33 = vld [vmem:[#allocation2 + $0x170] sm:$0xff] }
  0x4a   :  { %322 = vmatprep.subr.mxu0 %v141_v63  ;;  %392 = vmatpush1.msra.mxu1 %v142_v0  ;;  %v189_v34 = vld [vmem:[#allocation2 + $0x378] sm:$0xff]  ;;  %v123_v35 = vld [vmem:[#allocation2 + $0x168] sm:$0xff]  ;;  %v188_v36 = vld [vmem:[#allocation2 + $0x370] sm:$0xff] }
  0x4b   :  { %323 = vmatpush2.msra.mxu0 %v140_v1  ;;  %393 = vmatprep.subr.mxu1 %v205_v2  ;;  %v122_v37 = vld [vmem:[#allocation2 + $0x160] sm:$0xff]  ;;  %v187_v38 = vld [vmem:[#allocation2 + $0x368] sm:$0xff]  ;;  %v121_v39 = vld [vmem:[#allocation2 + $0x158] sm:$0xff] }
  0x4c   :  { %324 = vmatprep.subr.mxu0 %v139_v3  ;;  %394 = vmatpush2.msra.mxu1 %v204_v4  ;;  %v186_v40 = vld [vmem:[#allocation2 + $0x360] sm:$0xff]  ;;  %v120_v41 = vld [vmem:[#allocation2 + $0x150] sm:$0xff]  ;;  %v185_v42 = vld [vmem:[#allocation2 + $0x358] sm:$0xff] }
  0x4d   :  { %325 = vmatpush2.msra.mxu0 %v138_v5  ;;  %395 = vmatprep.subr.mxu1 %v203_v6  ;;  %v119_v43 = vld [vmem:[#allocation2 + $0x148] sm:$0xff]  ;;  %v184_v44 = vld [vmem:[#allocation2 + $0x350] sm:$0xff]  ;;  %v118_v45 = vld [vmem:[#allocation2 + $0x140] sm:$0xff] }
  0x4e   :  { %326 = vmatprep.subr.mxu0 %v137_v7  ;;  %396 = vmatpush2.msra.mxu1 %v202_v8  ;;  %v183_v46 = vld [vmem:[#allocation2 + $0x348] sm:$0xff]  ;;  %v117_v47 = vld [vmem:[#allocation2 + $0x138] sm:$0xff]  ;;  %v182_v48 = vld [vmem:[#allocation2 + $0x340] sm:$0xff] }
  0x4f   :  { %327 = vmatpush2.msra.mxu0 %v136_v9  ;;  %397 = vmatprep.subr.mxu1 %v201_v10  ;;  %v116_v49 = vld [vmem:[#allocation2 + $0x130] sm:$0xff]  ;;  %v181_v50 = vld [vmem:[#allocation2 + $0x338] sm:$0xff]  ;;  %v115_v51 = vld [vmem:[#allocation2 + $0x128] sm:$0xff] }
  0x50   :  { %328 = vmatprep.subr.mxu0 %v135_v11  ;;  %398 = vmatpush2.msra.mxu1 %v200_v12  ;;  %v180_v52 = vld [vmem:[#allocation2 + $0x330] sm:$0xff]  ;;  %v114_v53 = vld [vmem:[#allocation2 + $0x120] sm:$0xff]  ;;  %v179_v54 = vld [vmem:[#allocation2 + $0x328] sm:$0xff] }
  0x51   :  { %329 = vmatpush2.msra.mxu0 %v134_v13  ;;  %399 = vmatprep.subr.mxu1 %v199_v14  ;;  %v113_v55 = vld [vmem:[#allocation2 + $0x118] sm:$0xff]  ;;  %v178_v56 = vld [vmem:[#allocation2 + $0x320] sm:$0xff]  ;;  %v112_v57 = vld [vmem:[#allocation2 + $0x110] sm:$0xff] }
  0x52   :  { %330 = vmatprep.subr.mxu0 %v133_v15  ;;  %400 = vmatpush2.msra.mxu1 %v198_v16  ;;  %v177_v58 = vld [vmem:[#allocation2 + $0x318] sm:$0xff]  ;;  %v111_v59 = vld [vmem:[#allocation2 + $0x108] sm:$0xff]  ;;  %v110_v61 = vld [vmem:[#allocation2 + $0x100] sm:$0xff] }
  0x53   :  { %331 = vmatpush2.msra.mxu0 %v132_v17  ;;  %401 = vmatprep.subr.mxu1 %v197_v18  ;;  %v72_v60 = vld [vmem:[%s1561_s0 + $0x8] sm:$0xff]  ;;  %v176_v62 = vld [vmem:[#allocation2 + $0x310] sm:$0xff]  ;;  %v71_v63 = vld [vmem:[%s1561_s0] sm:$0xff] }
  0x54   :  { %332 = vmatprep.subr.mxu0 %v131_v19  ;;  %402 = vmatpush2.msra.mxu1 %v196_v20  ;;  %v175_v0 = vld [vmem:[#allocation2 + $0x308] sm:$0xff]  ;;  %v237_v1 = vld [vmem:[#allocation2 + $0x4f8] sm:$0xff]  ;;  %v174_v2 = vld [vmem:[#allocation2 + $0x300] sm:$0xff] }
  0x55   :  { %333 = vmatpush2.msra.mxu0 %v130_v21  ;;  %403 = vmatprep.subr.mxu1 %v195_v22  ;;  %v74_v3 = vld [vmem:[%s1561_s0 + $0x18] sm:$0xff]  ;;  %v236_v4 = vld [vmem:[#allocation2 + $0x4f0] sm:$0xff]  ;;  %v235_v6 = vld [vmem:[#allocation2 + $0x4e8] sm:$0xff]  ;;  %v1385_v22 = vmov 0.0  }
  0x56   :  { %334 = vmatprep.subr.mxu0 %v129_v23  ;;  %404 = vmatpush2.msra.mxu1 %v194_v24  ;;  %v73_v5 = vld [vmem:[%s1561_s0 + $0x10] sm:$0xff]  ;;  %v234_v7 = vld [vmem:[#allocation2 + $0x4e0] sm:$0xff]  ;;  %v273_v8 = vld [vmem:[#allocation2 + $0x618] sm:$0xff] }
  0x57   :  { %335 = vmatpush2.msra.mxu0 %v128_v25  ;;  %405 = vmatprep.subr.mxu1 %v193_v26  ;;  %v233_v9 = vld [vmem:[#allocation2 + $0x4d8] sm:$0xff]  ;;  %v272_v10 = vld [vmem:[#allocation2 + $0x610] sm:$0xff]  ;;  %v271_v12 = vld [vmem:[#allocation2 + $0x608] sm:$0xff] }
  0x58   :  { %336 = vmatprep.subr.mxu0 %v127_v27  ;;  %406 = vmatpush2.msra.mxu1 %v192_v28  ;;  %v232_v11 = vld [vmem:[#allocation2 + $0x4d0] sm:$0xff]  ;;  %v231_v13 = vld [vmem:[#allocation2 + $0x4c8] sm:$0xff]  ;;  %v230_v15 = vld [vmem:[#allocation2 + $0x4c0] sm:$0xff] }
  0x59   :  { %337 = vmatpush2.msra.mxu0 %v126_v29  ;;  %407 = vmatprep.subr.mxu1 %v191_v30  ;;  %v76_v14 = vld [vmem:[%s1561_s0 + $0x28] sm:$0xff]  ;;  %v270_v16 = vld [vmem:[#allocation2 + $0x600] sm:$0xff]  ;;  %v229_v17 = vld [vmem:[#allocation2 + $0x4b8] sm:$0xff] }
  0x5a   :  { %338 = vmatprep.subr.mxu0 %v125_v31  ;;  %408 = vmatpush2.msra.mxu1 %v190_v32  ;;  %v228_v18 = vld [vmem:[#allocation2 + $0x4b0] sm:$0xff]  ;;  %v227_v20 = vld [vmem:[#allocation2 + $0x4a8] sm:$0xff]  ;;  %v226_v21 = vld [vmem:[#allocation2 + $0x4a0] sm:$0xff] }
  0x5b   :  { %339 = vmatpush2.msra.mxu0 %v124_v33  ;;  %409 = vmatprep.subr.mxu1 %v189_v34  ;;  %v77_v19 = vld [vmem:[%s1561_s0 + $0x30] sm:$0xff]  ;;  %v225_v23 = vld [vmem:[#allocation2 + $0x498] sm:$0xff]  ;;  %v223_v25 = vld [vmem:[#allocation2 + $0x488] sm:$0xff] }
  0x5c   :  { %340 = vmatprep.subr.mxu0 %v123_v35  ;;  %410 = vmatpush2.msra.mxu1 %v188_v36  ;;  %v224_v24 = vld [vmem:[#allocation2 + $0x490] sm:$0xff]  ;;  %v222_v26 = vld [vmem:[#allocation2 + $0x480] sm:$0xff]  ;;  %v221_v27 = vld [vmem:[#allocation2 + $0x478] sm:$0xff] }
  0x5d   :  { %341 = vmatpush2.msra.mxu0 %v122_v37  ;;  %411 = vmatprep.subr.mxu1 %v187_v38  ;;  %v220_v28 = vld [vmem:[#allocation2 + $0x470] sm:$0xff]  ;;  %v219_v29 = vld [vmem:[#allocation2 + $0x468] sm:$0xff]  ;;  %v218_v30 = vld [vmem:[#allocation2 + $0x460] sm:$0xff] }
  0x5e   :  { %342 = vmatprep.subr.mxu0 %v121_v39  ;;  %412 = vmatpush2.msra.mxu1 %v186_v40  ;;  %v217_v31 = vld [vmem:[#allocation2 + $0x458] sm:$0xff]  ;;  %v216_v32 = vld [vmem:[#allocation2 + $0x450] sm:$0xff]  ;;  %v215_v33 = vld [vmem:[#allocation2 + $0x448] sm:$0xff] }
  0x5f   :  { %343 = vmatpush2.msra.mxu0 %v120_v41  ;;  %413 = vmatprep.subr.mxu1 %v185_v42  ;;  %v214_v34 = vld [vmem:[#allocation2 + $0x440] sm:$0xff]  ;;  %v213_v35 = vld [vmem:[#allocation2 + $0x438] sm:$0xff]  ;;  %v212_v36 = vld [vmem:[#allocation2 + $0x430] sm:$0xff] }
  0x60   :  { %344 = vmatprep.subr.mxu0 %v119_v43  ;;  %414 = vmatpush2.msra.mxu1 %v184_v44  ;;  %v211_v37 = vld [vmem:[#allocation2 + $0x428] sm:$0xff]  ;;  %v210_v38 = vld [vmem:[#allocation2 + $0x420] sm:$0xff]  ;;  %v209_v39 = vld [vmem:[#allocation2 + $0x418] sm:$0xff] }
  0x61   :  { %345 = vmatpush2.msra.mxu0 %v118_v45  ;;  %415 = vmatprep.subr.mxu1 %v183_v46  ;;  %v208_v40 = vld [vmem:[#allocation2 + $0x410] sm:$0xff]  ;;  %v207_v41 = vld [vmem:[#allocation2 + $0x408] sm:$0xff]  ;;  %v206_v42 = vld [vmem:[#allocation2 + $0x400] sm:$0xff] }
  0x62   :  { %346 = vmatprep.subr.mxu0 %v117_v47  ;;  %416 = vmatpush2.msra.mxu1 %v182_v48  ;;  %v269_v43 = vld [vmem:[#allocation2 + $0x5f8] sm:$0xff]  ;;  %v268_v44 = vld [vmem:[#allocation2 + $0x5f0] sm:$0xff]  ;;  %v267_v45 = vld [vmem:[#allocation2 + $0x5e8] sm:$0xff] }
  0x63   :  { %347 = vmatpush2.msra.mxu0 %v116_v49  ;;  %417 = vmatprep.subr.mxu1 %v181_v50  ;;  %v266_v46 = vld [vmem:[#allocation2 + $0x5e0] sm:$0xff]  ;;  %v265_v47 = vld [vmem:[#allocation2 + $0x5d8] sm:$0xff]  ;;  %v264_v48 = vld [vmem:[#allocation2 + $0x5d0] sm:$0xff] }
  0x64   :  { %348 = vmatprep.subr.mxu0 %v115_v51  ;;  %418 = vmatpush2.msra.mxu1 %v180_v52  ;;  %v263_v49 = vld [vmem:[#allocation2 + $0x5c8] sm:$0xff]  ;;  %v262_v50 = vld [vmem:[#allocation2 + $0x5c0] sm:$0xff]  ;;  %v261_v51 = vld [vmem:[#allocation2 + $0x5b8] sm:$0xff] }
  0x65   :  { %349 = vmatpush2.msra.mxu0 %v114_v53  ;;  %419 = vmatprep.subr.mxu1 %v179_v54  ;;  %v260_v52 = vld [vmem:[#allocation2 + $0x5b0] sm:$0xff]  ;;  %v259_v53 = vld [vmem:[#allocation2 + $0x5a8] sm:$0xff]  ;;  %v258_v54 = vld [vmem:[#allocation2 + $0x5a0] sm:$0xff] }
  0x66   :  { %350 = vmatprep.subr.mxu0 %v113_v55  ;;  %420 = vmatpush2.msra.mxu1 %v178_v56  ;;  %v257_v55 = vld [vmem:[#allocation2 + $0x598] sm:$0xff]  ;;  %v256_v56 = vld [vmem:[#allocation2 + $0x590] sm:$0xff] }
  0x67   :  { %351 = vmatpush2.msra.mxu0 %v112_v57  ;;  %421 = vmatprep.subr.mxu1 %v177_v58  ;;  %v255_v57 = vld [vmem:[#allocation2 + $0x588] sm:$0xff]  ;;  %v254_v58 = vld [vmem:[#allocation2 + $0x580] sm:$0xff] }
  0x68   :  { %352 = vmatprep.subr.mxu0 %v111_v59  ;;  %354 = vmatprep.mubr.f32.mxu0 %v72_v60  ;;  %v253_v59 = vld [vmem:[#allocation2 + $0x578] sm:$0xff]  ;;  %v252_v60 = vld [vmem:[#allocation2 + $0x570] sm:$0xff] }
  0x69   :  { %353 = vmatpush2.msra.mxu0 %v110_v61  ;;  %422 = vmatpush2.msra.mxu1 %v176_v62  ;;  %v251_v61 = vld [vmem:[#allocation2 + $0x568] sm:$0xff]  ;;  %v250_v62 = vld [vmem:[#allocation2 + $0x560] sm:$0xff] }
  0x6a   :  { %355 = vmatmul.mubr.f32.vlgmr.msra.gmra.mxu0 %v71_v63  ;;  %423 = vmatprep.subr.mxu1 %v175_v0  ;;  %v249_v63 = vld [vmem:[#allocation2 + $0x558] sm:$0xff]  ;;  %v248_v0 = vld [vmem:[#allocation2 + $0x550] sm:$0xff] }
  0x6b   :  { %432 = vmatprep.subr.mxu0 %v237_v1  ;;  %424 = vmatpush2.msra.mxu1 %v174_v2  ;;  %v247_v1 = vld [vmem:[#allocation2 + $0x548] sm:$0xff]  ;;  %v246_v2 = vld [vmem:[#allocation2 + $0x540] sm:$0xff] }
  0x6c   :  { %425 = vmatprep.mubr.f32.mxu1 %v74_v3  ;;  %433 = vmatpush1.msra.mxu0 %v236_v4  ;;  %v245_v3 = vld [vmem:[#allocation2 + $0x538] sm:$0xff]  ;;  %v244_v4 = vld [vmem:[#allocation2 + $0x530] sm:$0xff] }
  0x6d   :  { %426 = vmatmul.mubr.f32.vlgmr.msra.gmra.mxu1 %v73_v5  ;;  %434 = vmatprep.subr.mxu0 %v235_v6  ;;  %v243_v5 = vld [vmem:[#allocation2 + $0x528] sm:$0xff]  ;;  %v242_v6 = vld [vmem:[#allocation2 + $0x520] sm:$0xff] }
  0x6e   :  { %435 = vmatpush1.msra.mxu0 %v234_v7  ;;  %531 = vmatprep.subr.mxu1 %v273_v8  ;;  %v241_v7 = vld [vmem:[#allocation2 + $0x518] sm:$0xff]  ;;  %v240_v8 = vld [vmem:[#allocation2 + $0x510] sm:$0xff] }
  0x6f   :  { %436 = vmatprep.subr.mxu0 %v233_v9  ;;  %532 = vmatpush1.msra.mxu1 %v272_v10  ;;  %v239_v9 = vld [vmem:[#allocation2 + $0x508] sm:$0xff]  ;;  %v238_v10 = vld [vmem:[#allocation2 + $0x500] sm:$0xff] }
  0x70   :  { %437 = vmatpush1.msra.mxu0 %v232_v11  ;;  %533 = vmatprep.subr.mxu1 %v271_v12  ;;  %v75_v11 = vld [vmem:[%s1561_s0 + $0x20] sm:$0xff]  ;;  %v607_v12 = vld [vmem:[#allocation5 + $0xf8] sm:$0xff] }
  0x71   :  { %438 = vmatprep.subr.mxu0 %v231_v13  ;;  %496 = vmatprep.mubr.f32.mxu0 %v76_v14  ;;  %v591_v13 = vld [vmem:[#allocation5 + $0x78] sm:$0xff]  ;;  %v606_v14 = vld [vmem:[#allocation5 + $0xf0] sm:$0xff] }
  0x72   :  { %439 = vmatpush1.msra.mxu0 %v230_v15  ;;  %534 = vmatpush1.msra.mxu1 %v270_v16  ;;  %v590_v15 = vld [vmem:[#allocation5 + $0x70] sm:$0xff]  ;;  %v605_v16 = vld [vmem:[#allocation5 + $0xe8] sm:$0xff] }
  0x73   :  { %440 = vmatprep.subr.mxu0 %v229_v17  ;;  %567 = vmatprep.mubr.f32.mxu1 %v1385_v22  ;;  %v589_v17 = vld [vmem:[#allocation5 + $0x68] sm:$0xff] }
  0x74   :  { %441 = vmatpush1.msra.mxu0 %v228_v18  ;;  %1151 = vmatmul.mubr.msk.f32.vlgmr.msra.gmra.mxu1 %vm286_vm0, %v77_v19  ;;  %v604_v18 = vld [vmem:[#allocation5 + $0xe0] sm:$0xff] }
  0x75   :  { %442 = vmatprep.subr.mxu0 %v227_v20  ;;  %1159 = vmatprep.subr.mxu1 %v607_v12  ;;  %v588_v19 = vld [vmem:[#allocation5 + $0x60] sm:$0xff]  ;;  %v603_v20 = vld [vmem:[#allocation5 + $0xd8] sm:$0xff]  ;;  %v695_v12 = vld [vmem:[%s1566_s5 + $0x48] sm:$0xff] }
  0x76   :  { %443 = vmatpush1.msra.mxu0 %v226_v21  ;;  %1160 = vmatpush3.msra.mxu1 %v591_v13  ;;  %v587_v21 = vld [vmem:[#allocation5 + $0x58] sm:$0xff]  ;;  %v694_v13 = vld [vmem:[%s1566_s5 + $0x40] sm:$0xff] }
  0x77   :  { %444 = vmatprep.subr.mxu0 %v225_v23  ;;  %1161 = vmatprep.subr.mxu1 %v606_v14  ;;  %v602_v23 = vld [vmem:[#allocation5 + $0xd0] sm:$0xff]  ;;  %v693_v14 = vld [vmem:[%s1566_s5 + $0x38] sm:$0xff] }
  0x78   :  { %445 = vmatpush1.msra.mxu0 %v224_v24  ;;  %1162 = vmatpush3.msra.mxu1 %v590_v15  ;;  %v586_v24 = vld [vmem:[#allocation5 + $0x50] sm:$0xff] }
  0x79   :  { %446 = vmatprep.subr.mxu0 %v223_v25  ;;  %1163 = vmatprep.subr.mxu1 %v605_v16  ;;  %v601_v25 = vld [vmem:[#allocation5 + $0xc8] sm:$0xff]  ;;  %v692_v15 = vld [vmem:[%s1566_s5 + $0x30] sm:$0xff] }
  0x7a   :  { %447 = vmatpush1.msra.mxu0 %v222_v26  ;;  %1164 = vmatpush3.msra.mxu1 %v589_v17  ;;  %v585_v26 = vld [vmem:[#allocation5 + $0x48] sm:$0xff]  ;;  %v690_v17 = vld [vmem:[%s1566_s5 + $0x20] sm:$0xff] }
  0x7b   :  { %448 = vmatprep.subr.mxu0 %v221_v27  ;;  %1165 = vmatprep.subr.mxu1 %v604_v18  ;;  %v600_v27 = vld [vmem:[#allocation5 + $0xc0] sm:$0xff]  ;;  %v691_v16 = vld [vmem:[%s1566_s5 + $0x28] sm:$0xff]  ;;  %v689_v18 = vld [vmem:[%s1566_s5 + $0x18] sm:$0xff] }
  0x7c   :  { %449 = vmatpush1.msra.mxu0 %v220_v28  ;;  %1166 = vmatpush3.msra.mxu1 %v588_v19  ;;  %v584_v28 = vld [vmem:[#allocation5 + $0x40] sm:$0xff]  ;;  %v688_v19 = vld [vmem:[%s1566_s5 + $0x10] sm:$0xff] }
  0x7d   :  { %450 = vmatprep.subr.mxu0 %v219_v29  ;;  %1167 = vmatprep.subr.mxu1 %v603_v20  ;;  %v599_v29 = vld [vmem:[#allocation5 + $0xb8] sm:$0xff]  ;;  %v687_v20 = vld [vmem:[%s1566_s5 + $0x8] sm:$0xff] }
  0x7e   :  { %451 = vmatpush1.msra.mxu0 %v218_v30  ;;  %1168 = vmatpush3.msra.mxu1 %v587_v21  ;;  %v583_v30 = vld [vmem:[#allocation5 + $0x38] sm:$0xff]  ;;  %v686_v21 = vld [vmem:[%s1566_s5] sm:$0xff] }
  0x7f   :  { %452 = vmatprep.subr.mxu0 %v217_v31  ;;  %1169 = vmatprep.subr.mxu1 %v602_v23  ;;  %v598_v31 = vld [vmem:[#allocation5 + $0xb0] sm:$0xff] }
  0x80   :  { %453 = vmatpush1.msra.mxu0 %v216_v32  ;;  %1170 = vmatpush3.msra.mxu1 %v586_v24  ;;  %v582_v32 = vld [vmem:[#allocation5 + $0x30] sm:$0xff]  ;;  %v1152_v24 = vld [vmem:[%s1565_s4] ss:$0 sm:$0xff] }
  0x81   :  { %454 = vmatprep.subr.mxu0 %v215_v33  ;;  %1171 = vmatprep.subr.mxu1 %v601_v25  ;;  %v597_v33 = vld [vmem:[#allocation5 + $0xa8] sm:$0xff] }
  0x82   :  { %455 = vmatpush1.msra.mxu0 %v214_v34  ;;  %1172 = vmatpush3.msra.mxu1 %v585_v26  ;;  %v581_v34 = vld [vmem:[#allocation5 + $0x28] sm:$0xff] }
  0x83   :  { %456 = vmatprep.subr.mxu0 %v213_v35  ;;  %1173 = vmatprep.subr.mxu1 %v600_v27  ;;  %v596_v35 = vld [vmem:[#allocation5 + $0xa0] sm:$0xff] }
  0x84   :  { %457 = vmatpush1.msra.mxu0 %v212_v36  ;;  %1174 = vmatpush3.msra.mxu1 %v584_v28  ;;  %v580_v36 = vld [vmem:[#allocation5 + $0x20] sm:$0xff] }
  0x85   :  { %458 = vmatprep.subr.mxu0 %v211_v37  ;;  %1175 = vmatprep.subr.mxu1 %v599_v29  ;;  %v595_v37 = vld [vmem:[#allocation5 + $0x98] sm:$0xff]  ;;  %v835_v29 = vld [vmem:[#allocation7 + $0x190] sm:$0xff] }
  0x86   :  { %459 = vmatpush1.msra.mxu0 %v210_v38  ;;  %1176 = vmatpush3.msra.mxu1 %v583_v30  ;;  %v579_v38 = vld [vmem:[#allocation5 + $0x18] sm:$0xff]  ;;  %v837_v30 = vld [vmem:[#allocation7 + $0x1a0] sm:$0xff] }
  0x87   :  { %460 = vmatprep.subr.mxu0 %v209_v39  ;;  %1177 = vmatprep.subr.mxu1 %v598_v31  ;;  %v594_v39 = vld [vmem:[#allocation5 + $0x90] sm:$0xff]  ;;  %v834_v31 = vld [vmem:[#allocation7 + $0x188] sm:$0xff] }
  0x88   :  { %461 = vmatpush1.msra.mxu0 %v208_v40  ;;  %1178 = vmatpush3.msra.mxu1 %v582_v32  ;;  %v578_v40 = vld [vmem:[#allocation5 + $0x10] sm:$0xff]  ;;  %v836_v32 = vld [vmem:[#allocation7 + $0x198] sm:$0xff] }
  0x89   :  { %462 = vmatprep.subr.mxu0 %v207_v41  ;;  %1179 = vmatprep.subr.mxu1 %v597_v33  ;;  %v593_v41 = vld [vmem:[#allocation5 + $0x88] sm:$0xff]  ;;  %v828_v33 = vld [vmem:[#allocation7 + $0x158] sm:$0xff] }
  0x8a   :  { %463 = vmatpush1.msra.mxu0 %v206_v42  ;;  %1180 = vmatpush3.msra.mxu1 %v581_v34  ;;  %v577_v42 = vld [vmem:[#allocation5 + $0x8] sm:$0xff] }
  0x8b   :  { %464 = vmatprep.subr.mxu0 %v269_v43  ;;  %1181 = vmatprep.subr.mxu1 %v596_v35  ;;  %v592_v43 = vld [vmem:[#allocation5 + $0x80] sm:$0xff]  ;;  %v830_v34 = vld [vmem:[#allocation7 + $0x168] sm:$0xff]  ;;  %v827_v35 = vld [vmem:[#allocation7 + $0x150] sm:$0xff] }
  0x8c   :  { %465 = vmatpush2.msra.mxu0 %v268_v44  ;;  %1182 = vmatpush3.msra.mxu1 %v580_v36  ;;  %v576_v44 = vld [vmem:[#allocation5] sm:$0xff] }
  0x8d   :  { %466 = vmatprep.subr.mxu0 %v267_v45  ;;  %1183 = vmatprep.subr.mxu1 %v595_v37  ;;  %v276_v45 = vlaneseq  ;;  %v829_v36 = vld [vmem:[#allocation7 + $0x160] sm:$0xff] }
  0x8e   :  { %467 = vmatpush2.msra.mxu0 %v266_v46  ;;  %1184 = vmatpush3.msra.mxu1 %v579_v38  ;;  %v821_v37 = vld [vmem:[#allocation7 + $0x120] sm:$0xff]  ;;  %v823_v38 = vld [vmem:[#allocation7 + $0x130] sm:$0xff] }
  0x8f   :  { %468 = vmatprep.subr.mxu0 %v265_v47  ;;  %1185 = vmatprep.subr.mxu1 %v594_v39  ;;  %v277_v46 = vshrl.u32 %v276_v45, 7  ;;  %v820_v39 = vld [vmem:[#allocation7 + $0x118] sm:$0xff]  ;;  %v807_v45 = vld [vmem:[#allocation7 + $0xb0] sm:$0xff] }
  0x90   :  { %469 = vmatpush2.msra.mxu0 %v264_v48  ;;  %1186 = vmatpush3.msra.mxu1 %v578_v40  ;;  %v274_v48 = vld [vmem:[%s1563_s2] sm:$0x3]  ;;  %v822_v40 = vld [vmem:[#allocation7 + $0x128] sm:$0xff] }
  0x91   :  { %470 = vmatprep.subr.mxu0 %v263_v49  ;;  %1187 = vmatprep.subr.mxu1 %v593_v41  ;;  %v278_v47 = vsub.s32 0, %v277_v46  ;;  %v282_v49 = vsub.s32 1, %v277_v46  ;;  %v814_v41 = vld [vmem:[#allocation7 + $0xe8] sm:$0xff]  ;;  %v809_v46 = vld [vmem:[#allocation7 + $0xc0] sm:$0xff] }
  0x92   :  { %471 = vmatpush2.msra.mxu0 %v262_v50  ;;  %1188 = vmatpush3.msra.mxu1 %v577_v42  ;;  %v816_v42 = vld [vmem:[#allocation7 + $0xf8] sm:$0xff] }
  0x93   :  { %472 = vmatprep.subr.mxu0 %v261_v51  ;;  %1189 = vmatprep.subr.mxu1 %v592_v43  ;;  %v279_v51 = vrot.slane %v274_v48, %v278_v47  ;;  %v813_v43 = vld [vmem:[#allocation7 + $0xe0] sm:$0xff]  ;;  %v806_v47 = vld [vmem:[#allocation7 + $0xa8] sm:$0xff] }
  0x94   :  { %473 = vmatpush2.msra.mxu0 %v260_v52  ;;  %1190 = vmatpush3.msra.mxu1 %v576_v44  ;;  %v283_v52 = vrot.slane %v274_v48, %v282_v49  ;;  %v815_v44 = vld [vmem:[#allocation7 + $0xf0] sm:$0xff]  ;;  %v808_v48 = vld [vmem:[#allocation7 + $0xb8] sm:$0xff] }
  0x95   :  { %474 = vmatprep.subr.mxu0 %v259_v53  ;;  %1220 = vmatprep.subr.mxu1 %v1385_v22  ;;  %v800_v49 = vld [vmem:[#allocation7 + $0x78] sm:$0xff] }
  0x96   :  { %475 = vmatpush2.msra.mxu0 %v258_v54 }
  0x97   :  { %476 = vmatprep.subr.mxu0 %v257_v55 }
  0x98   :  { %477 = vmatpush2.msra.mxu0 %v256_v56 }
  0x99   :  { %478 = vmatprep.subr.mxu0 %v255_v57 }
  0x9a   :  { %479 = vmatpush2.msra.mxu0 %v254_v58 }
  0x9b   :  { %480 = vmatprep.subr.mxu0 %v253_v59 }
  0x9c   :  { %481 = vmatpush2.msra.mxu0 %v252_v60 }
  0x9d   :  { %482 = vmatprep.subr.mxu0 %v251_v61 }
  0x9e   :  { %483 = vmatpush2.msra.mxu0 %v250_v62 }
  0x9f   :  { %484 = vmatprep.subr.mxu0 %v249_v63 }
  0xa0   :  { %485 = vmatpush2.msra.mxu0 %v248_v0 }
  0xa1   :  { %486 = vmatprep.subr.mxu0 %v247_v1 }
  0xa2   :  { %487 = vmatpush2.msra.mxu0 %v246_v2 }
  0xa3   :  { %488 = vmatprep.subr.mxu0 %v245_v3 }
  0xa4   :  { %489 = vmatpush2.msra.mxu0 %v244_v4 }
  0xa5   :  { %490 = vmatprep.subr.mxu0 %v243_v5 }
  0xa6   :  { %491 = vmatpush2.msra.mxu0 %v242_v6  ;;  %v701_v6 = vld [vmem:[%s1566_s5 + $0x78] sm:$0xff] }
  0xa7   :  { %492 = vmatprep.subr.mxu0 %v241_v7  ;;  %v700_v7 = vld [vmem:[%s1566_s5 + $0x70] sm:$0xff] }
  0xa8   :  { %493 = vmatpush2.msra.mxu0 %v240_v8  ;;  %v699_v8 = vld [vmem:[%s1566_s5 + $0x68] sm:$0xff] }
  0xa9   :  { %494 = vmatprep.subr.mxu0 %v239_v9  ;;  %v698_v9 = vld [vmem:[%s1566_s5 + $0x60] sm:$0xff] }
  0xaa   :  { %495 = vmatpush2.msra.mxu0 %v238_v10  ;;  %v697_v10 = vld [vmem:[%s1566_s5 + $0x58] sm:$0xff] }
  0xab   :  { %497 = vmatmul.mubr.f32.vlgmr.msra.gmra.mxu0 %v75_v11  ;;  %v696_v11 = vld [vmem:[%s1566_s5 + $0x50] sm:$0xff]  ;;  %861 = vmatprep.subr.mxu0 %v835_v29 }
  0xac   :  { %909 = vmatprep.mubr.f32.mxu0 %v1385_v22  ;;  %862 = vmatpush1.msra.mxu0 %v834_v31  ;;  %v791_v29 = vld [vmem:[#allocation7 + $0x30] sm:$0xff] }
  0xad   :  { %863 = vmatprep.subr.mxu0 %v828_v33 }
  0xae   :  { %864 = vmatpush1.msra.mxu0 %v827_v35 }
  0xaf   :  { %865 = vmatprep.subr.mxu0 %v821_v37 }
  0xb0   :  { %866 = vmatpush1.msra.mxu0 %v820_v39 }
  0xb1   :  { %867 = vmatprep.subr.mxu0 %v814_v41 }
  0xb2   :  { %868 = vmatpush1.msra.mxu0 %v813_v43 }
  0xb3   :  { %869 = vmatprep.subr.mxu0 %v807_v45 }
  0xb4   :  { %870 = vmatpush1.msra.mxu0 %v806_v47 }
  0xb5   :  { %871 = vmatprep.subr.mxu0 %v800_v49 }
 0x12a   :  { %v356_v50 = vpop.f32.mrf.mxu0 }
 0x12b   :  { %v357_v55 = vadd.f32 %v356_v50, %v279_v51  ;;  %v802_v50 = vld [vmem:[#allocation7 + $0x88] sm:$0xff]  ;;  %v799_v51 = vld [vmem:[#allocation7 + $0x70] sm:$0xff] }
 0x12c   :  { %v358_v53 = vpop.f32.mrf.mxu0  ;;  %872 = vmatpush1.msra.mxu0 %v799_v51 }
 0x12d   :  { %v427_v54 = vpop.f32.mrf.mxu1  ;;  %v359_v56 = vadd.f32 %v358_v53, %v283_v52  ;;  %v801_v52 = vld [vmem:[#allocation7 + $0x80] sm:$0xff] }
 0x12e   :  { %v428_v58 = vadd.f32 %v427_v54, %v357_v55  ;;  %v793_v53 = vld [vmem:[#allocation7 + $0x40] sm:$0xff]  ;;  %v795_v54 = vld [vmem:[#allocation7 + $0x50] sm:$0xff]  ;;  %v792_v55 = vld [vmem:[#allocation7 + $0x38] sm:$0xff] }
 0x12f   :  { %v429_v57 = vpop.f32.mrf.mxu1  ;;  %873 = vmatprep.subr.mxu0 %v793_v53 }
 0x130   :  { %v430_v61 = vadd.f32 %v429_v57, %v359_v56  ;;  %v794_v56 = vld [vmem:[#allocation7 + $0x48] sm:$0xff]  ;;  %874 = vmatpush1.msra.mxu0 %v792_v55 }
 0x131   :  { %v786_v57 = vld [vmem:[#allocation7 + $0x8] sm:$0xff] }
 0x132   :  { %875 = vmatprep.subr.mxu0 %v786_v57 }
 0x134   :  { %v569_v60 = vpop.f32.mrf.mxu1 }
 0x136   :  { %v571_v2 = vpop.f32.mrf.mxu1 }
 0x16b   :  { %v498_v59 = vpop.f32.mrf.mxu0 }
 0x16c   :  { %v499_v62 = vadd.f32 %v498_v59, %v428_v58  ;;  %v788_v58 = vld [vmem:[#allocation7 + $0x18] sm:$0xff]  ;;  %v785_v59 = vld [vmem:[#allocation7] sm:$0xff] }
 0x16d   :  { %v500_v63 = vpop.f32.mrf.mxu0  ;;  %876 = vmatpush1.msra.mxu0 %v785_v59 }
 0x16e   :  { %v501_v0 = vadd.f32 %v500_v63, %v430_v61  ;;  %v570_v1 = vadd.f32 %v569_v60, %v499_v62  ;;  %v787_v60 = vld [vmem:[#allocation7 + $0x10] sm:$0xff]  ;;  %v1153_v62 = vld [vmem:[%s1567_s6] ss:$0 sm:$0xff]  ;;  %s1387_s6 = smov [#allocation8]  }
 0x16f   :  { %v839_v61 = vld [vmem:[#allocation7 + $0x1b0] sm:$0xff]  ;;  %s1141_s21 = sshll.u32 %s1387_s6, 4  ;;  %s1142_s21 = int_to_ptr.vmem [resolvable:$true] %s1141_s21 }
 0x170   :  { %v572_v3 = vadd.f32 %v571_v2, %v501_v0  ;;  %v574_v5 = vmax.f32 %v570_v1, 0.0  ;;  %1003 = vmatprep.subr.mxu0 %v839_v61  ;;  %s1350_s22 = scalar_lea.vmem %s1142_s21, 896  ;;  %p1355_p2 = scmp.lt.s32.totalorder %s1142_s21, %s1142_s21 }
 0x171   :  { %p1351_p1 = scmp.ne.s32.totalorder %s1142_s21, %s1350_s22  ;;  %p1356_p3 = scmp.lt.s32.totalorder %s1350_s22, %s1350_s22 }
 0x172   :  { %v575_v4 = vmax.f32 %v572_v3, 0.0 }
 0x173   :  { %p1357_p4 = por %p1356_p3, %p1355_p2 }
 0x174   :  { %679 = vmatprep.mubr.f32.mxu1 %v575_v4 }
 0x175   :  { %680 = vmatmul.mubr.f32.vlgmr.msra.gmra.mxu1 %v574_v5  ;;  %v838_v5 = vld [vmem:[#allocation7 + $0x1a8] sm:$0xff]  ;;  %p1358_p5 = pnand %p1357_p4, %p1351_p1 }
 0x176   :  { %1221 = vmatpush3.msra.mxu1 %v701_v6  ;;  %1252 = vmatprep.mubr.msk.f32.mxu1 %vm1386_vm1, %v1385_v22  ;;  %v840_v6 = vld [vmem:[#allocation7 + $0x1b8] sm:$0xff] }
 0x177   :  { %1222 = vmatprep.subr.mxu1 %v1385_v22 }
 0x178   :  { %1223 = vmatpush3.msra.mxu1 %v700_v7 }
 0x179   :  { %1224 = vmatprep.subr.mxu1 %v1385_v22 }
 0x17a   :  { %1225 = vmatpush3.msra.mxu1 %v699_v8  ;;  %v832_v8 = vld [vmem:[#allocation7 + $0x178] sm:$0xff] }
 0x17b   :  { %1226 = vmatprep.subr.mxu1 %v1385_v22 }
 0x17c   :  { %1227 = vmatpush3.msra.mxu1 %v698_v9  ;;  %v831_v9 = vld [vmem:[#allocation7 + $0x170] sm:$0xff] }
 0x17d   :  { %1228 = vmatprep.subr.mxu1 %v1385_v22 }
 0x17e   :  { %1229 = vmatpush3.msra.mxu1 %v697_v10  ;;  %v833_v10 = vld [vmem:[#allocation7 + $0x180] sm:$0xff] }
 0x17f   :  { %1230 = vmatprep.subr.mxu1 %v1385_v22 }
 0x180   :  { %1231 = vmatpush3.msra.mxu1 %v696_v11  ;;  %v825_v11 = vld [vmem:[#allocation7 + $0x140] sm:$0xff] }
 0x181   :  { %1232 = vmatprep.subr.mxu1 %v1385_v22 }
 0x182   :  { %1233 = vmatpush3.msra.mxu1 %v695_v12  ;;  %v824_v12 = vld [vmem:[#allocation7 + $0x138] sm:$0xff] }
 0x183   :  { %1234 = vmatprep.subr.mxu1 %v1385_v22 }
 0x184   :  { %1235 = vmatpush3.msra.mxu1 %v694_v13  ;;  %v826_v13 = vld [vmem:[#allocation7 + $0x148] sm:$0xff] }
 0x185   :  { %1236 = vmatprep.subr.mxu1 %v1385_v22 }
 0x186   :  { %1237 = vmatpush3.msra.mxu1 %v693_v14  ;;  %v818_v14 = vld [vmem:[#allocation7 + $0x108] sm:$0xff] }
 0x187   :  { %1238 = vmatprep.subr.mxu1 %v1385_v22 }
 0x188   :  { %1239 = vmatpush3.msra.mxu1 %v692_v15  ;;  %v817_v15 = vld [vmem:[#allocation7 + $0x100] sm:$0xff] }
 0x189   :  { %1240 = vmatprep.subr.mxu1 %v1385_v22 }
 0x18a   :  { %1241 = vmatpush3.msra.mxu1 %v691_v16  ;;  %v819_v16 = vld [vmem:[#allocation7 + $0x110] sm:$0xff] }
 0x18b   :  { %1242 = vmatprep.subr.mxu1 %v1385_v22 }
 0x18c   :  { %1243 = vmatpush3.msra.mxu1 %v690_v17  ;;  %v811_v17 = vld [vmem:[#allocation7 + $0xd0] sm:$0xff] }
 0x18d   :  { %1244 = vmatprep.subr.mxu1 %v1385_v22 }
 0x18e   :  { %1245 = vmatpush3.msra.mxu1 %v689_v18  ;;  %v810_v18 = vld [vmem:[#allocation7 + $0xc8] sm:$0xff] }
 0x18f   :  { %1246 = vmatprep.subr.mxu1 %v1385_v22 }
 0x190   :  { %1247 = vmatpush3.msra.mxu1 %v688_v19  ;;  %v812_v19 = vld [vmem:[#allocation7 + $0xd8] sm:$0xff] }
 0x191   :  { %1248 = vmatprep.subr.mxu1 %v1385_v22 }
 0x192   :  { %1249 = vmatpush3.msra.mxu1 %v687_v20  ;;  %v804_v20 = vld [vmem:[#allocation7 + $0x98] sm:$0xff] }
 0x193   :  { %1250 = vmatprep.subr.mxu1 %v1385_v22 }
 0x194   :  { %1251 = vmatpush3.msra.mxu1 %v686_v21  ;;  %v803_v21 = vld [vmem:[#allocation7 + $0x90] sm:$0xff] }
 0x195   :  { %932 = vmatprep.subr.mxu1 %v837_v30 }
 0x235   :  { %v1191_v23 = vpop.f32.mrf.mxu1 }
 0x237   :  { %v1192_v25 = vpop.f32.mrf.mxu1 }
 0x238   :  { %v1193_v26 = vadd.f32 %v1192_v25, %v1191_v23  ;;  %v805_v23 = vld [vmem:[#allocation7 + $0xa0] sm:$0xff]  ;;  %v796_v25 = vld [vmem:[#allocation7 + $0x58] sm:$0xff] }
 0x23a   :  { %v682_v27 = vadd.f32 %v1193_v26, %v1152_v24  ;;  %v797_v24 = vld [vmem:[#allocation7 + $0x60] sm:$0xff]  ;;  %v798_v26 = vld [vmem:[#allocation7 + $0x68] sm:$0xff] }
 0x23c   :  { %v685_v28 = vmax.f32 %v682_v27, 0.0  ;;  %v790_v27 = vld [vmem:[#allocation7 + $0x28] sm:$0xff] }
 0x23e   :  { %1253 = vmatmul.mubr.f32.vlgmr.msra.gmra.mxu1 %v685_v28  ;;  %v789_v28 = vld [vmem:[#allocation7 + $0x20] sm:$0xff] }
 0x23f   :  { %980 = vmatprep.mubr.f32.mxu1 %v1385_v22  ;;  %933 = vmatpush1.msra.mxu1 %v836_v32 }
 0x240   :  { %934 = vmatprep.subr.mxu1 %v830_v34 }
 0x241   :  { %935 = vmatpush1.msra.mxu1 %v829_v36 }
 0x242   :  { %936 = vmatprep.subr.mxu1 %v823_v38 }
 0x243   :  { %937 = vmatpush1.msra.mxu1 %v822_v40 }
 0x244   :  { %938 = vmatprep.subr.mxu1 %v816_v42 }
 0x245   :  { %939 = vmatpush1.msra.mxu1 %v815_v44 }
 0x246   :  { %940 = vmatprep.subr.mxu1 %v809_v46 }
 0x247   :  { %941 = vmatpush1.msra.mxu1 %v808_v48 }
 0x248   :  { %942 = vmatprep.subr.mxu1 %v802_v50 }
 0x249   :  { %943 = vmatpush1.msra.mxu1 %v801_v52 }
 0x24a   :  { %944 = vmatprep.subr.mxu1 %v795_v54 }
 0x24b   :  { %945 = vmatpush1.msra.mxu1 %v794_v56 }
 0x24c   :  { %946 = vmatprep.subr.mxu1 %v788_v58 }
 0x24d   :  { %947 = vmatpush1.msra.mxu1 %v787_v60 }
 0x24e   :  { %1255 = vmatprep.subr.mxu1 %v1385_v22 }
 0x2fe   :  { %v775_v63 = vpop.f32.mrf.mxu1 }
 0x2ff   :  { %v776_v0 = vadd.f32 %v1153_v62, %v775_v63 }
 0x300   :  { %v1254_v1 = vpop.f32.mrf.mxu1 }
 0x301   :  { %v1154_v2 = vmul.f32 -1.442695, %v776_v0 }
 0x303   :  { %1286 = vpow2.f32 %v1154_v2 }
 0x310   :  { %v1287_v3 = vpop.eup %1286 }
 0x311   :  { %v782_v4 = vadd.f32 1.0, %v1287_v3 }
 0x313   :  { %1288 = vrcp.f32 %v782_v4 }
 0x320   :  { %v1289_v7 = vpop.eup %1288 }
 0x321   :  { %1155 = vmatmul.mubr.msk.f32.vlgmr.msra.gmra.mxu0 %vm841_vm2, %v1289_v7  ;;  %1156 = vmatmul.mubr.msk.f32.vlgmr.msra.gmra.mxu1 %vm841_vm2, %v1289_v7 }
 0x322   :  { %1004 = vmatpush1.msra.mxu0 %v838_v5  ;;  %1256 = vmatpush3.msra.mxu1 %v840_v6 }
 0x323   :  { %1005 = vmatprep.subr.mxu0 %v832_v8  ;;  %1257 = vmatprep.subr.mxu1 %v1385_v22 }
 0x324   :  { %1006 = vmatpush1.msra.mxu0 %v831_v9  ;;  %1258 = vmatpush3.msra.mxu1 %v833_v10 }
 0x325   :  { %1007 = vmatprep.subr.mxu0 %v825_v11  ;;  %1259 = vmatprep.subr.mxu1 %v1385_v22 }
 0x326   :  { %1008 = vmatpush1.msra.mxu0 %v824_v12  ;;  %1260 = vmatpush3.msra.mxu1 %v826_v13 }
 0x327   :  { %1009 = vmatprep.subr.mxu0 %v818_v14  ;;  %1261 = vmatprep.subr.mxu1 %v1385_v22 }
 0x328   :  { %1010 = vmatpush1.msra.mxu0 %v817_v15  ;;  %1262 = vmatpush3.msra.mxu1 %v819_v16 }
 0x329   :  { %1011 = vmatprep.subr.mxu0 %v811_v17  ;;  %1263 = vmatprep.subr.mxu1 %v1385_v22 }
 0x32a   :  { %1012 = vmatpush1.msra.mxu0 %v810_v18  ;;  %1264 = vmatpush3.msra.mxu1 %v812_v19 }
 0x32b   :  { %1013 = vmatprep.subr.mxu0 %v804_v20  ;;  %1265 = vmatprep.subr.mxu1 %v1385_v22 }
 0x32c   :  { %1014 = vmatpush1.msra.mxu0 %v803_v21  ;;  %1266 = vmatpush3.msra.mxu1 %v805_v23 }
 0x32d   :  { %1015 = vmatprep.subr.mxu0 %v797_v24  ;;  %1267 = vmatprep.subr.mxu1 %v1385_v22 }
 0x32e   :  { %1016 = vmatpush1.msra.mxu0 %v796_v25  ;;  %1268 = vmatpush3.msra.mxu1 %v798_v26 }
 0x32f   :  { %1017 = vmatprep.subr.mxu0 %v790_v27  ;;  %1269 = vmatprep.subr.mxu1 %v1385_v22 }
 0x330   :  { %1018 = vmatpush1.msra.mxu0 %v789_v28  ;;  %1051 = vmatprep.mubr.f32.mxu0 %v1385_v22 }
 0x331   :  { %1270 = vmatpush3.msra.mxu1 %v791_v29  ;;  %1271 = vmatprep.mubr.msk.f32.mxu1 %vm1386_vm1, %v1385_v22 }
 0x332   :  { %1157 = vmatmul.mubr.msk.f32.vlgmr.msra.gmra.mxu0 %vm841_vm2, %v1289_v7  ;;  %1272 = vmatmul.mubr.msk.f32.vlgmr.msra.gmra.mxu1 %vm841_vm2, %v1289_v7 }
 0x3e1   :  { %v911_v30 = vpop.f32.mrf.mxu0  ;;  %v982_v31 = vpop.f32.mrf.mxu1 }
 0x3e2   :  { %1128 = vst [vmem:[#allocation8] sm:$0xff] %v911_v30  ;;  %1130 = vst [vmem:[#allocation8 + $0x10] sm:$0xff] %v982_v31 }
 0x3e3   :  { %v913_v32 = vpop.f32.mrf.mxu0  ;;  %v984_v33 = vpop.f32.mrf.mxu1 }
 0x3e4   :  { %1129 = vst [vmem:[#allocation8 + $0x8] sm:$0xff] %v913_v32  ;;  %1131 = vst [vmem:[#allocation8 + $0x18] sm:$0xff] %v984_v33 }
 0x3f2   :  { %v1053_v34 = vpop.f32.mrf.mxu0  ;;  %v1124_v35 = vpop.f32.mrf.mxu1 }
 0x3f3   :  { %1132 = vst [vmem:[#allocation8 + $0x20] sm:$0xff] %v1053_v34  ;;  %1134 = vst.msk [vmem:[#allocation8 + $0x30] sm:$0xff] %vm286_vm0, %v1124_v35 }
 0x3f4   :  { %v1055_v22 = vpop.f32.mrf.mxu0  ;;  %v1273_v36 = vpop.f32.mrf.mxu1 }
 0x3f5   :  { %1133 = vst [vmem:[#allocation8 + $0x28] sm:$0xff] %v1055_v22 }
 0x3f6   :  { %1361 = shalt.err (!%p1358_p5)
}
 0x3f7   :  { %1144 = dma.vmem_to_hbm [thread:$0]  %s1142_s21, 896, %s1569_s8, [#allocation4]  }
 0x3f8   :  { %1374 = dma.done.wait [#allocation4], 896  }
 0x3f9   :  { %1375 = vsyncadd [#allocation4], 4294966400 }
 0x3fa   :  { %1148 = vsyncpa [#allocation3], 1 }
 0x3fb   :  { %1149 = vsyncpa [#allocation6], 1 }
 0x3fc   :  { %1150 = vsyncpa [#allocation4], 1 }

</bundles_post_ra>
